<compile_context>
chip_gen: v7x
topology: tpu7x:2x2x1
jax: 0.10.0
libtpu: 0.0.40
codegen_flags: <defaults>
</compile_context>

<pallas_src>
import math

import jax
import jax.numpy as jnp
from jax.experimental import pallas as pl
from jax.experimental.pallas import tpu as pltpu

# ----------------- config (small, consistent with module signature) -----------
N_LAYERS = 2
D_MODEL = 32
N_HEAD = 4
N_ACTIVE = 2
D_ATTN = 8
D_FF = 64
VOCAB = 100
MAX_LEN = 16
SEQ = 8
BATCH = 2
LN_EPS = 1e-5
HDA = N_HEAD * D_ATTN
SCALE = 1.0 / math.sqrt(D_ATTN)

# vector-slab row layout ([L, 16, D_FF]):
ROW_BR, ROW_B1, ROW_B2 = 0, 1, 2
ROW_G1, ROW_BT1, ROW_G2, ROW_BT2 = 3, 4, 5, 6
ROW_WR = 8           # rows 8..11 hold wr^T ([H, D])
VEC_ROWS = 16


# ----------------- fused Pallas kernel -----------------------------------------
def _encoder_kernel(x_ref, w_attn_ref, w_ffn_ref, vec_ref, o_ref):
    B, S, D = x_ref.shape
    BS = B * S
    HB = N_HEAD * B

    xf = x_ref[...].reshape(BS, D)                                 # [BS, D]

    # Block-diagonal pooling matrix: per-batch token sum via the (idle) MXU
    # instead of a cross-sublane XLU reduction.  Hoisted out of the layer loop.
    row = jax.lax.broadcasted_iota(jnp.int32, (B, BS), 0)
    col = jax.lax.broadcasted_iota(jnp.int32, (B, BS), 1)
    pool_mat = ((col >= row * S) & (col < (row + 1) * S)).astype(jnp.float32)

    for l in range(N_LAYERS):                                      # static loop
        vec = vec_ref[l]                                           # [16, DFF]
        br = vec[ROW_BR:ROW_BR + 1, :N_HEAD]                       # [1, H]
        b1 = vec[ROW_B1:ROW_B1 + 1, :]                             # [1, DFF]
        b2 = vec[ROW_B2:ROW_B2 + 1, :D]                            # [1, D]
        g1 = vec[ROW_G1:ROW_G1 + 1, :D]
        bt1 = vec[ROW_BT1:ROW_BT1 + 1, :D]
        g2 = vec[ROW_G2:ROW_G2 + 1, :D]
        bt2 = vec[ROW_BT2:ROW_BT2 + 1, :D]
        wrT = vec[ROW_WR:ROW_WR + N_HEAD, :D]                      # [H, D]

        # ---- routing: MXU sum-pool, score heads, keep top N_ACTIVE ----------
        pooled = jnp.dot(pool_mat, xf,
                         preferred_element_type=jnp.float32)       # [B, D]
        scores = jax.lax.dot_general(
            pooled, wrT, (((1,), (1,)), ((), ())),
            preferred_element_type=jnp.float32) + br               # [B, H]
        scores = scores - jnp.max(scores, axis=-1, keepdims=True)
        e = jnp.exp(scores)
        dist = e * pl.reciprocal(jnp.sum(e, axis=-1, keepdims=True),
                                 approx=False)                     # [B, H]
        # top-k via counting: keep heads with < N_ACTIVE strictly-larger peers
        cnt = jnp.zeros_like(dist)
        for j in range(N_HEAD):
            cnt = cnt + (dist[:, j:j + 1] > dist).astype(jnp.float32)
        gate = jnp.where(cnt < float(N_ACTIVE), dist, 0.0)
        gate = gate * pl.reciprocal(jnp.sum(gate, axis=-1, keepdims=True),
                                    approx=False)                  # [B, H]

        # ---- attention: head-batched dot_general (batch dim = head*batch) ---
        wa = w_attn_ref[l]                                         # [4H, D, DA]
        wqkv = wa[0:3 * N_HEAD]                                    # [3H, D, DA]
        woT = wa[3 * N_HEAD:4 * N_HEAD]                            # [H, D, DA]

        x_bc = jnp.broadcast_to(xf, (3 * N_HEAD, BS, D))           # [3H, BS, D]
        qkv = jax.lax.dot_general(
            x_bc, wqkv, (((2,), (1,)), ((0,), (0,))),
            preferred_element_type=jnp.float32)                    # [3H, BS, DA]
        q = qkv[0:N_HEAD].reshape(HB, S, D_ATTN)                   # [HB, S, DA]
        k = qkv[N_HEAD:2 * N_HEAD].reshape(HB, S, D_ATTN)
        v = qkv[2 * N_HEAD:3 * N_HEAD].reshape(HB, S, D_ATTN)

        s = jax.lax.dot_general(
            q, k, (((2,), (2,)), ((0,), (0,))),
            preferred_element_type=jnp.float32) * SCALE            # [HB, S, S]
        s = s - jnp.max(s, axis=-1, keepdims=True)
        p = jnp.exp(s)
        p = p * pl.reciprocal(jnp.sum(p, axis=-1, keepdims=True),
                              approx=False)
        ctx = jax.lax.dot_general(
            p, v, (((2,), (1,)), ((0,), (0,))),
            preferred_element_type=jnp.float32)                    # [HB, S, DA]

        woT_bc = jnp.broadcast_to(
            woT[:, None], (N_HEAD, B, D, D_ATTN)).reshape(HB, D, D_ATTN)
        proj = jax.lax.dot_general(
            ctx, woT_bc, (((2,), (2,)), ((0,), (0,))),
            preferred_element_type=jnp.float32)                    # [HB, S, D]

        # gate heads and combine: [HB,S,D] -> [B,H,S,D] -> weighted sum over H
        proj = jnp.transpose(proj.reshape(N_HEAD, B, S, D), (1, 0, 2, 3))
        attn = jnp.sum(proj * gate[:, :, None, None],
                       axis=1).reshape(BS, D)                      # [BS, D]

        # ---- residual + LayerNorm 1 -----------------------------------------
        z = xf + attn
        mu = jnp.mean(z, axis=-1, keepdims=True)
        var = jnp.mean((z - mu) ** 2, axis=-1, keepdims=True)
        xf = (z - mu) * jax.lax.rsqrt(var + LN_EPS) * g1 + bt1

        # ---- FFN + residual + LayerNorm 2 -----------------------------------
        wf = w_ffn_ref[l]                                          # [D+DFF, DFF]
        w1 = wf[0:D, :]                                            # [D, DFF]
        w2 = wf[D:D + D_FF, 0:D]                                   # [DFF, D]
        h1 = jnp.maximum(
            jnp.dot(xf, w1, preferred_element_type=jnp.float32) + b1, 0.0)
        f = jnp.dot(h1, w2, preferred_element_type=jnp.float32) + b2
        z = xf + f
        mu = jnp.mean(z, axis=-1, keepdims=True)
        var = jnp.mean((z - mu) ** 2, axis=-1, keepdims=True)
        xf = (z - mu) * jax.lax.rsqrt(var + LN_EPS) * g2 + bt2

    o_ref[...] = xf.reshape(B, S, D)


def fused_encoder_forward(x, w_attn, w_ffn, vec):
    """Full N_LAYERS encoder stack in one grid-less pallas_call."""
    B, S, D = x.shape
    vmem = lambda: pl.BlockSpec(memory_space=pltpu.MemorySpace.VMEM)
    return pl.pallas_call(
        _encoder_kernel,
        out_shape=jax.ShapeDtypeStruct((B, S, D), jnp.float32),
        in_specs=[vmem(), vmem(), vmem(), vmem()],
        out_specs=vmem(),
    )(x, w_attn, w_ffn, vec)


# ----------------- glue: embedding, positional encoding, weight packing --------
def positional_encoding(max_len, d_model):
    pos = jnp.arange(max_len, dtype=jnp.float32)[:, None]
    div = jnp.exp(jnp.arange(0, d_model, 2, dtype=jnp.float32)
                  * (-math.log(10000.0) / d_model))
    pe = jnp.zeros((max_len, d_model), dtype=jnp.float32)
    pe = pe.at[:, 0::2].set(jnp.sin(pos * div))
    pe = pe.at[:, 1::2].set(jnp.cos(pos * div))
    return pe


def _pack_layers(layers):
    """Pack all per-layer weights into 3 lane-dense slabs (few DMA descriptors)."""
    L = len(layers)
    stk = lambda name: jnp.stack([ly[name] for ly in layers])      # lead dim L

    # attention slab [L, 4H, D, DA]: rows = wq heads, wk heads, wv heads, wo^T heads
    woT = jnp.transpose(stk("wo"), (0, 1, 3, 2))                   # [L, H, D, DA]
    w_attn = jnp.concatenate([stk("wq"), stk("wk"), stk("wv"), woT], axis=1)

    # FFN slab [L, D+DFF, DFF]: rows 0:D = w1, rows D:D+DFF = w2 (col-padded)
    w1 = stk("w1")                                                 # [L, D, DFF]
    w2 = jnp.pad(stk("w2"), ((0, 0), (0, 0), (0, D_FF - D_MODEL)))  # [L, DFF, DFF]
    w_ffn = jnp.concatenate([w1, w2], axis=1)                      # [L, D+DFF, DFF]

    # vector slab [L, 16, DFF]: biases, LN params, router weight (transposed)
    def vrow(v):
        v = v.reshape(L, 1, -1)
        return jnp.pad(v, ((0, 0), (0, 0), (0, D_FF - v.shape[-1])))
    wrT = jnp.pad(jnp.transpose(stk("wr"), (0, 2, 1)),
                  ((0, 0), (0, 0), (0, D_FF - D_MODEL)))           # [L, H, DFF]
    vec = jnp.concatenate(
        [vrow(stk("br")), vrow(stk("b1")), vrow(stk("b2")),
         vrow(stk("ln1_g")), vrow(stk("ln1_b")),
         vrow(stk("ln2_g")), vrow(stk("ln2_b")),
         jnp.zeros((L, 1, D_FF), jnp.float32),
         wrT,
         jnp.zeros((L, VEC_ROWS - ROW_WR - N_HEAD, D_FF), jnp.float32)],
        axis=1)                                                    # [L, 16, DFF]
    return w_attn, w_ffn, vec


@jax.jit
def sparse_transformer_forward(tokens, params):
    # Preprocess: embedding gather + positional encoding (dropout = identity).
    emb = jnp.take(params["embed"], tokens, axis=0)                # [B, S, D]
    pe = params["pos_enc"][: tokens.shape[1]]
    x = emb + pe[None, :, :]
    w_attn, w_ffn, vec = _pack_layers(params["layers"])
    return fused_encoder_forward(x, w_attn, w_ffn, vec)


# ----------------- pure-JAX reference (for correctness check) ------------------
def _layer_norm(z, g, b):
    mu = jnp.mean(z, axis=-1, keepdims=True)
    var = jnp.mean((z - mu) ** 2, axis=-1, keepdims=True)
    return (z - mu) * jax.lax.rsqrt(var + LN_EPS) * g + b


def reference_forward(tokens, params):
    emb = jnp.take(params["embed"], tokens, axis=0)
    pe = params["pos_enc"][: tokens.shape[1]]
    x = emb + pe[None, :, :]
    for layer in params["layers"]:
        pooled = jnp.sum(x, axis=1)                                # [B, D]
        scores = pooled @ layer["wr"] + layer["br"]                # [B, H]
        dist = jax.nn.softmax(scores, axis=-1)
        vals, idx = jax.lax.top_k(dist, N_ACTIVE)
        vals = vals / jnp.sum(vals, axis=-1, keepdims=True)
        gate = jnp.zeros_like(dist).at[
            jnp.arange(dist.shape[0])[:, None], idx].set(vals)
        q = jnp.einsum("bsd,hde->bhse", x, layer["wq"])
        k = jnp.einsum("bsd,hde->bhse", x, layer["wk"])
        v = jnp.einsum("bsd,hde->bhse", x, layer["wv"])
        s = jnp.einsum("bhqe,bhke->bhqk", q, k) / math.sqrt(D_ATTN)
        p = jax.nn.softmax(s, axis=-1)
        o = jnp.einsum("bhqk,bhke->bhqe", p, v)
        proj = jnp.einsum("bhse,hed->bhsd", o, layer["wo"])
        attn = jnp.einsum("bh,bhsd->bsd", gate, proj)
        x = _layer_norm(x + attn, layer["ln1_g"], layer["ln1_b"])
        h1 = jnp.maximum(x @ layer["w1"] + layer["b1"], 0.0)
        f = h1 @ layer["w2"] + layer["b2"]
        x = _layer_norm(x + f, layer["ln2_g"], layer["ln2_b"])
    return x


# ----------------- params ------------------------------------------------------
def init_params(key):
    keys = jax.random.split(key, 2 + N_LAYERS)
    params = {
        "embed": jax.random.normal(keys[0], (VOCAB, D_MODEL), jnp.float32) * 0.02,
        "pos_enc": positional_encoding(MAX_LEN, D_MODEL),
        "layers": [],
    }
    for l in range(N_LAYERS):
        lk = jax.random.split(keys[2 + l], 8)
        s_qkv = 1.0 / math.sqrt(D_MODEL)
        s_o = 1.0 / math.sqrt(D_ATTN)
        s_ff1 = 1.0 / math.sqrt(D_MODEL)
        s_ff2 = 1.0 / math.sqrt(D_FF)
        layer = {
            "wq": jax.random.normal(lk[0], (N_HEAD, D_MODEL, D_ATTN), jnp.float32) * s_qkv,
            "wk": jax.random.normal(lk[1], (N_HEAD, D_MODEL, D_ATTN), jnp.float32) * s_qkv,
            "wv": jax.random.normal(lk[2], (N_HEAD, D_MODEL, D_ATTN), jnp.float32) * s_qkv,
            "wo": jax.random.normal(lk[3], (N_HEAD, D_ATTN, D_MODEL), jnp.float32) * s_o,
            "wr": jax.random.normal(lk[4], (D_MODEL, N_HEAD), jnp.float32) * s_qkv,
            "br": jnp.zeros((N_HEAD,), jnp.float32),
            "w1": jax.random.normal(lk[5], (D_MODEL, D_FF), jnp.float32) * s_ff1,
            "b1": jnp.zeros((D_FF,), jnp.float32),
            "w2": jax.random.normal(lk[6], (D_FF, D_MODEL), jnp.float32) * s_ff2,
            "b2": jnp.zeros((D_MODEL,), jnp.float32),
            "ln1_g": jnp.ones((D_MODEL,), jnp.float32),
            "ln1_b": jnp.zeros((D_MODEL,), jnp.float32),
            "ln2_g": jnp.ones((D_MODEL,), jnp.float32),
            "ln2_b": jnp.zeros((D_MODEL,), jnp.float32),
        }
        params["layers"].append(layer)
    return params


if __name__ == "__main__":
    key = jax.random.PRNGKey(0)
    pkey, tkey = jax.random.split(key)
    params = init_params(pkey)
    tokens = jax.random.randint(tkey, (BATCH, SEQ), 0, VOCAB, dtype=jnp.int32)

    out = sparse_transformer_forward(tokens, params)
    out = jax.block_until_ready(out)

    ref = jax.block_until_ready(reference_forward(tokens, params))

    assert out.shape == (BATCH, SEQ, D_MODEL)
    assert jnp.all(jnp.isfinite(out))
    assert jnp.allclose(out, ref, atol=5e-4, rtol=5e-4), (
        float(jnp.max(jnp.abs(out - ref))))
    print("KERNEL_OK")
</pallas_src>

<mosaic_0001>
module attributes {stable_mosaic.version = 11 : i64} {
  func.func @_encoder_kernel(%arg0: memref<2x8x32xf32, #tpu.memory_space<vmem>>, %arg1: memref<2x16x32x8xf32, #tpu.memory_space<vmem>>, %arg2: memref<2x96x64xf32, #tpu.memory_space<vmem>>, %arg3: memref<2x16x64xf32, #tpu.memory_space<vmem>>, %arg4: memref<2x8x32xf32, #tpu.memory_space<vmem>>) attributes {dimension_semantics = [], scalar_prefetch = 0 : i64, scratch_operands = 0 : i64, tpu.core_type = #tpu.core_type<tc>} {
    %c0 = arith.constant 0 : index
    %c0_0 = arith.constant 0 : index
    %c0_1 = arith.constant 0 : index
    %0 = vector.load %arg0[%c0, %c0_0, %c0_1] : memref<2x8x32xf32, #tpu.memory_space<vmem>>, vector<2x8x32xf32>
    %1 = vector.shape_cast %0 : vector<2x8x32xf32> to vector<16x32xf32>
    %2 = tpu.iota {dimensions = array<i32: 0>} : vector<2x16xi32>
    %3 = tpu.iota {dimensions = array<i32: 1>} : vector<2x16xi32>
    %c8_i32 = arith.constant 8 : i32
    %4 = vector.broadcast %c8_i32 : i32 to vector<2x16xi32>
    %5 = arith.muli %2, %4 : vector<2x16xi32>
    %6 = arith.cmpi sge, %3, %5 : vector<2x16xi32>
    %c1_i32 = arith.constant 1 : i32
    %7 = vector.broadcast %c1_i32 : i32 to vector<2x16xi32>
    %8 = arith.addi %2, %7 : vector<2x16xi32>
    %c8_i32_2 = arith.constant 8 : i32
    %9 = vector.broadcast %c8_i32_2 : i32 to vector<2x16xi32>
    %10 = arith.muli %8, %9 : vector<2x16xi32>
    %11 = arith.cmpi slt, %3, %10 : vector<2x16xi32>
    %12 = arith.andi %6, %11 : vector<2x16xi1>
    %13 = arith.extui %12 : vector<2x16xi1> to vector<2x16xi32>
    %14 = arith.sitofp %13 : vector<2x16xi32> to vector<2x16xf32>
    %c0_3 = arith.constant 0 : index
    %c0_4 = arith.constant 0 : index
    %c0_5 = arith.constant 0 : index
    %15 = vector.load %arg3[%c0_3, %c0_4, %c0_5] : memref<2x16x64xf32, #tpu.memory_space<vmem>>, vector<1x16x64xf32>
    %16 = vector.shape_cast %15 : vector<1x16x64xf32> to vector<16x64xf32>
    %17 = vector.extract_strided_slice %16 {offsets = [0, 0], sizes = [1, 4], strides = [1, 1]} : vector<16x64xf32> to vector<1x4xf32>
    %18 = vector.extract_strided_slice %16 {offsets = [1, 0], sizes = [1, 64], strides = [1, 1]} : vector<16x64xf32> to vector<1x64xf32>
    %19 = vector.extract_strided_slice %16 {offsets = [2, 0], sizes = [1, 32], strides = [1, 1]} : vector<16x64xf32> to vector<1x32xf32>
    %20 = vector.extract_strided_slice %16 {offsets = [3, 0], sizes = [1, 32], strides = [1, 1]} : vector<16x64xf32> to vector<1x32xf32>
    %21 = vector.extract_strided_slice %16 {offsets = [4, 0], sizes = [1, 32], strides = [1, 1]} : vector<16x64xf32> to vector<1x32xf32>
    %22 = vector.extract_strided_slice %16 {offsets = [5, 0], sizes = [1, 32], strides = [1, 1]} : vector<16x64xf32> to vector<1x32xf32>
    %23 = vector.extract_strided_slice %16 {offsets = [6, 0], sizes = [1, 32], strides = [1, 1]} : vector<16x64xf32> to vector<1x32xf32>
    %24 = vector.extract_strided_slice %16 {offsets = [8, 0], sizes = [4, 32], strides = [1, 1]} : vector<16x64xf32> to vector<4x32xf32>
    %cst = arith.constant dense<0.000000e+00> : vector<2x32xf32>
    %25 = tpu.matmul %14, %1, %cst {dimension_numbers = #tpu.dot_dimension_numbers<[1], [0], [0], [1], [0, 0, 1, 1], [], []>} : vector<2x16xf32>, vector<16x32xf32>, vector<2x32xf32> -> vector<2x32xf32>
    %cst_6 = arith.constant dense<0.000000e+00> : vector<2x4xf32>
    %26 = tpu.matmul %25, %24, %cst_6 {dimension_numbers = #tpu.dot_dimension_numbers<[1], [1], [0], [0], [0, 0, 1, 0], [], []>} : vector<2x32xf32>, vector<4x32xf32>, vector<2x4xf32> -> vector<2x4xf32>
    %27 = vector.broadcast %17 : vector<1x4xf32> to vector<2x4xf32>
    %28 = arith.addf %26, %27 : vector<2x4xf32>
    %cst_7 = arith.constant dense<0xFF800000> : vector<2xf32>
    %29 = vector.multi_reduction <maximumf>, %28, %cst_7 [1] : vector<2x4xf32> to vector<2xf32>
    %30 = vector.shape_cast %29 : vector<2xf32> to vector<2x1xf32>
    %31 = vector.broadcast %30 : vector<2x1xf32> to vector<2x4xf32>
    %32 = arith.subf %28, %31 : vector<2x4xf32>
    %33 = math.exp %32 : vector<2x4xf32>
    %cst_8 = arith.constant dense<0.000000e+00> : vector<2xf32>
    %34 = vector.multi_reduction <add>, %33, %cst_8 [1] : vector<2x4xf32> to vector<2xf32>
    %35 = vector.shape_cast %34 : vector<2xf32> to vector<2x1xf32>
    %36 = tpu.reciprocal %35 : vector<2x1xf32> -> vector<2x1xf32>
    %37 = vector.broadcast %36 : vector<2x1xf32> to vector<2x4xf32>
    %38 = arith.mulf %33, %37 : vector<2x4xf32>
    %cst_9 = arith.constant 0.000000e+00 : f32
    %39 = vector.broadcast %cst_9 : f32 to vector<2x4xf32>
    %40 = vector.extract_strided_slice %38 {offsets = [0, 0], sizes = [2, 1], strides = [1, 1]} : vector<2x4xf32> to vector<2x1xf32>
    %41 = vector.broadcast %40 : vector<2x1xf32> to vector<2x4xf32>
    %42 = arith.cmpf ogt, %41, %38 : vector<2x4xf32>
    %43 = arith.extui %42 : vector<2x4xi1> to vector<2x4xi32>
    %44 = arith.sitofp %43 : vector<2x4xi32> to vector<2x4xf32>
    %45 = arith.addf %39, %44 : vector<2x4xf32>
    %46 = vector.extract_strided_slice %38 {offsets = [0, 1], sizes = [2, 1], strides = [1, 1]} : vector<2x4xf32> to vector<2x1xf32>
    %47 = vector.broadcast %46 : vector<2x1xf32> to vector<2x4xf32>
    %48 = arith.cmpf ogt, %47, %38 : vector<2x4xf32>
    %49 = arith.extui %48 : vector<2x4xi1> to vector<2x4xi32>
    %50 = arith.sitofp %49 : vector<2x4xi32> to vector<2x4xf32>
    %51 = arith.addf %45, %50 : vector<2x4xf32>
    %52 = vector.extract_strided_slice %38 {offsets = [0, 2], sizes = [2, 1], strides = [1, 1]} : vector<2x4xf32> to vector<2x1xf32>
    %53 = vector.broadcast %52 : vector<2x1xf32> to vector<2x4xf32>
    %54 = arith.cmpf ogt, %53, %38 : vector<2x4xf32>
    %55 = arith.extui %54 : vector<2x4xi1> to vector<2x4xi32>
    %56 = arith.sitofp %55 : vector<2x4xi32> to vector<2x4xf32>
    %57 = arith.addf %51, %56 : vector<2x4xf32>
    %58 = vector.extract_strided_slice %38 {offsets = [0, 3], sizes = [2, 1], strides = [1, 1]} : vector<2x4xf32> to vector<2x1xf32>
    %59 = vector.broadcast %58 : vector<2x1xf32> to vector<2x4xf32>
    %60 = arith.cmpf ogt, %59, %38 : vector<2x4xf32>
    %61 = arith.extui %60 : vector<2x4xi1> to vector<2x4xi32>
    %62 = arith.sitofp %61 : vector<2x4xi32> to vector<2x4xf32>
    %63 = arith.addf %57, %62 : vector<2x4xf32>
    %cst_10 = arith.constant 2.000000e+00 : f32
    %64 = vector.broadcast %cst_10 : f32 to vector<2x4xf32>
    %65 = arith.cmpf olt, %63, %64 : vector<2x4xf32>
    %cst_11 = arith.constant 0.000000e+00 : f32
    %66 = vector.broadcast %cst_11 : f32 to vector<2x4xf32>
    %67 = arith.select %65, %38, %66 : vector<2x4xi1>, vector<2x4xf32>
    %cst_12 = arith.constant dense<0.000000e+00> : vector<2xf32>
    %68 = vector.multi_reduction <add>, %67, %cst_12 [1] : vector<2x4xf32> to vector<2xf32>
    %69 = vector.shape_cast %68 : vector<2xf32> to vector<2x1xf32>
    %70 = tpu.reciprocal %69 : vector<2x1xf32> -> vector<2x1xf32>
    %71 = vector.broadcast %70 : vector<2x1xf32> to vector<2x4xf32>
    %72 = arith.mulf %67, %71 : vector<2x4xf32>
    %c0_13 = arith.constant 0 : index
    %c0_14 = arith.constant 0 : index
    %c0_15 = arith.constant 0 : index
    %c0_16 = arith.constant 0 : index
    %73 = vector.load %arg1[%c0_13, %c0_14, %c0_15, %c0_16] : memref<2x16x32x8xf32, #tpu.memory_space<vmem>>, vector<1x16x32x8xf32>
    %74 = vector.shape_cast %73 : vector<1x16x32x8xf32> to vector<16x32x8xf32>
    %75 = vector.extract_strided_slice %74 {offsets = [0, 0, 0], sizes = [12, 32, 8], strides = [1, 1, 1]} : vector<16x32x8xf32> to vector<12x32x8xf32>
    %76 = vector.extract_strided_slice %74 {offsets = [12, 0, 0], sizes = [4, 32, 8], strides = [1, 1, 1]} : vector<16x32x8xf32> to vector<4x32x8xf32>
    %77 = vector.shape_cast %1 : vector<16x32xf32> to vector<1x16x32xf32>
    %78 = vector.broadcast %77 : vector<1x16x32xf32> to vector<12x16x32xf32>
    %cst_17 = arith.constant dense<0.000000e+00> : vector<12x16x8xf32>
    %79 = tpu.matmul %78, %75, %cst_17 {dimension_numbers = #tpu.dot_dimension_numbers<[2], [1], [1], [2], [0, 0, 0, 1, 1, 2], [0], [0]>} : vector<12x16x32xf32>, vector<12x32x8xf32>, vector<12x16x8xf32> -> vector<12x16x8xf32>
    %80 = vector.extract_strided_slice %79 {offsets = [0, 0, 0], sizes = [4, 16, 8], strides = [1, 1, 1]} : vector<12x16x8xf32> to vector<4x16x8xf32>
    %81 = vector.shape_cast %80 : vector<4x16x8xf32> to vector<8x8x8xf32>
    %82 = vector.extract_strided_slice %79 {offsets = [4, 0, 0], sizes = [4, 16, 8], strides = [1, 1, 1]} : vector<12x16x8xf32> to vector<4x16x8xf32>
    %83 = vector.shape_cast %82 : vector<4x16x8xf32> to vector<8x8x8xf32>
    %84 = vector.extract_strided_slice %79 {offsets = [8, 0, 0], sizes = [4, 16, 8], strides = [1, 1, 1]} : vector<12x16x8xf32> to vector<4x16x8xf32>
    %85 = vector.shape_cast %84 : vector<4x16x8xf32> to vector<8x8x8xf32>
    %cst_18 = arith.constant dense<0.000000e+00> : vector<8x8x8xf32>
    %86 = tpu.matmul %81, %83, %cst_18 {dimension_numbers = #tpu.dot_dimension_numbers<[2], [2], [1], [1], [0, 0, 0, 1, 1, 1], [0], [0]>} : vector<8x8x8xf32>, vector<8x8x8xf32>, vector<8x8x8xf32> -> vector<8x8x8xf32>
    %cst_19 = arith.constant 0.353553385 : f32
    %87 = vector.broadcast %cst_19 : f32 to vector<8x8x8xf32>
    %88 = arith.mulf %86, %87 : vector<8x8x8xf32>
    %cst_20 = arith.constant dense<0xFF800000> : vector<8x8xf32>
    %89 = vector.multi_reduction <maximumf>, %88, %cst_20 [2] : vector<8x8x8xf32> to vector<8x8xf32>
    %90 = vector.shape_cast %89 : vector<8x8xf32> to vector<8x8x1xf32>
    %91 = vector.broadcast %90 : vector<8x8x1xf32> to vector<8x8x8xf32>
    %92 = arith.subf %88, %91 : vector<8x8x8xf32>
    %93 = math.exp %92 : vector<8x8x8xf32>
    %cst_21 = arith.constant dense<0.000000e+00> : vector<8x8xf32>
    %94 = vector.multi_reduction <add>, %93, %cst_21 [2] : vector<8x8x8xf32> to vector<8x8xf32>
    %95 = vector.shape_cast %94 : vector<8x8xf32> to vector<8x8x1xf32>
    %96 = tpu.reciprocal %95 : vector<8x8x1xf32> -> vector<8x8x1xf32>
    %97 = vector.broadcast %96 : vector<8x8x1xf32> to vector<8x8x8xf32>
    %98 = arith.mulf %93, %97 : vector<8x8x8xf32>
    %cst_22 = arith.constant dense<0.000000e+00> : vector<8x8x8xf32>
    %99 = tpu.matmul %98, %85, %cst_22 {dimension_numbers = #tpu.dot_dimension_numbers<[2], [1], [1], [2], [0, 0, 0, 1, 1, 2], [0], [0]>} : vector<8x8x8xf32>, vector<8x8x8xf32>, vector<8x8x8xf32> -> vector<8x8x8xf32>
    %100 = vector.shape_cast %76 : vector<4x32x8xf32> to vector<4x1x32x8xf32>
    %101 = vector.shape_cast %100 : vector<4x1x32x8xf32> to vector<4x1x32x8xf32>
    %102 = vector.broadcast %101 : vector<4x1x32x8xf32> to vector<4x2x32x8xf32>
    %103 = vector.shape_cast %102 : vector<4x2x32x8xf32> to vector<8x32x8xf32>
    %cst_23 = arith.constant dense<0.000000e+00> : vector<8x8x32xf32>
    %104 = tpu.matmul %99, %103, %cst_23 {dimension_numbers = #tpu.dot_dimension_numbers<[2], [2], [1], [1], [0, 0, 0, 1, 1, 1], [0], [0]>} : vector<8x8x8xf32>, vector<8x32x8xf32>, vector<8x8x32xf32> -> vector<8x8x32xf32>
    %105 = vector.shape_cast %104 : vector<8x8x32xf32> to vector<4x2x8x32xf32>
    %106 = tpu.transpose %105, [1, 0, 2, 3] : vector<4x2x8x32xf32> -> vector<2x4x8x32xf32>
    %107 = vector.shape_cast %72 : vector<2x4xf32> to vector<2x4x1x1xf32>
    %108 = vector.broadcast %107 : vector<2x4x1x1xf32> to vector<2x4x8x32xf32>
    %109 = arith.mulf %106, %108 : vector<2x4x8x32xf32>
    %cst_24 = arith.constant dense<0.000000e+00> : vector<2x8x32xf32>
    %110 = vector.multi_reduction <add>, %109, %cst_24 [1] : vector<2x4x8x32xf32> to vector<2x8x32xf32>
    %111 = vector.shape_cast %110 : vector<2x8x32xf32> to vector<16x32xf32>
    %112 = arith.addf %1, %111 : vector<16x32xf32>
    %cst_25 = arith.constant dense<0.000000e+00> : vector<16xf32>
    %113 = vector.multi_reduction <add>, %112, %cst_25 [1] : vector<16x32xf32> to vector<16xf32>
    %114 = vector.shape_cast %113 : vector<16xf32> to vector<16x1xf32>
    %cst_26 = arith.constant 3.200000e+01 : f32
    %115 = vector.broadcast %cst_26 : f32 to vector<16x1xf32>
    %116 = arith.divf %114, %115 : vector<16x1xf32>
    %117 = vector.broadcast %116 : vector<16x1xf32> to vector<16x32xf32>
    %118 = arith.subf %112, %117 : vector<16x32xf32>
    %119 = arith.mulf %118, %118 : vector<16x32xf32>
    %cst_27 = arith.constant dense<0.000000e+00> : vector<16xf32>
    %120 = vector.multi_reduction <add>, %119, %cst_27 [1] : vector<16x32xf32> to vector<16xf32>
    %121 = vector.shape_cast %120 : vector<16xf32> to vector<16x1xf32>
    %cst_28 = arith.constant 3.200000e+01 : f32
    %122 = vector.broadcast %cst_28 : f32 to vector<16x1xf32>
    %123 = arith.divf %121, %122 : vector<16x1xf32>
    %124 = vector.broadcast %116 : vector<16x1xf32> to vector<16x32xf32>
    %125 = arith.subf %112, %124 : vector<16x32xf32>
    %cst_29 = arith.constant 9.99999974E-6 : f32
    %126 = vector.broadcast %cst_29 : f32 to vector<16x1xf32>
    %127 = arith.addf %123, %126 : vector<16x1xf32>
    %128 = math.rsqrt %127 : vector<16x1xf32>
    %129 = vector.broadcast %128 : vector<16x1xf32> to vector<16x32xf32>
    %130 = arith.mulf %125, %129 : vector<16x32xf32>
    %131 = vector.broadcast %20 : vector<1x32xf32> to vector<16x32xf32>
    %132 = arith.mulf %130, %131 : vector<16x32xf32>
    %133 = vector.broadcast %21 : vector<1x32xf32> to vector<16x32xf32>
    %134 = arith.addf %132, %133 : vector<16x32xf32>
    %c0_30 = arith.constant 0 : index
    %c0_31 = arith.constant 0 : index
    %c0_32 = arith.constant 0 : index
    %135 = vector.load %arg2[%c0_30, %c0_31, %c0_32] : memref<2x96x64xf32, #tpu.memory_space<vmem>>, vector<1x96x64xf32>
    %136 = vector.shape_cast %135 : vector<1x96x64xf32> to vector<96x64xf32>
    %137 = vector.extract_strided_slice %136 {offsets = [0, 0], sizes = [32, 64], strides = [1, 1]} : vector<96x64xf32> to vector<32x64xf32>
    %138 = vector.extract_strided_slice %136 {offsets = [32, 0], sizes = [64, 32], strides = [1, 1]} : vector<96x64xf32> to vector<64x32xf32>
    %cst_33 = arith.constant dense<0.000000e+00> : vector<16x64xf32>
    %139 = tpu.matmul %134, %137, %cst_33 {dimension_numbers = #tpu.dot_dimension_numbers<[1], [0], [0], [1], [0, 0, 1, 1], [], []>} : vector<16x32xf32>, vector<32x64xf32>, vector<16x64xf32> -> vector<16x64xf32>
    %140 = vector.broadcast %18 : vector<1x64xf32> to vector<16x64xf32>
    %141 = arith.addf %139, %140 : vector<16x64xf32>
    %cst_34 = arith.constant 0.000000e+00 : f32
    %142 = vector.broadcast %cst_34 : f32 to vector<16x64xf32>
    %143 = arith.maximumf %141, %142 : vector<16x64xf32>
    %cst_35 = arith.constant dense<0.000000e+00> : vector<16x32xf32>
    %144 = tpu.matmul %143, %138, %cst_35 {dimension_numbers = #tpu.dot_dimension_numbers<[1], [0], [0], [1], [0, 0, 1, 1], [], []>} : vector<16x64xf32>, vector<64x32xf32>, vector<16x32xf32> -> vector<16x32xf32>
    %145 = vector.broadcast %19 : vector<1x32xf32> to vector<16x32xf32>
    %146 = arith.addf %144, %145 : vector<16x32xf32>
    %147 = arith.addf %134, %146 : vector<16x32xf32>
    %cst_36 = arith.constant dense<0.000000e+00> : vector<16xf32>
    %148 = vector.multi_reduction <add>, %147, %cst_36 [1] : vector<16x32xf32> to vector<16xf32>
    %149 = vector.shape_cast %148 : vector<16xf32> to vector<16x1xf32>
    %cst_37 = arith.constant 3.200000e+01 : f32
    %150 = vector.broadcast %cst_37 : f32 to vector<16x1xf32>
    %151 = arith.divf %149, %150 : vector<16x1xf32>
    %152 = vector.broadcast %151 : vector<16x1xf32> to vector<16x32xf32>
    %153 = arith.subf %147, %152 : vector<16x32xf32>
    %154 = arith.mulf %153, %153 : vector<16x32xf32>
    %cst_38 = arith.constant dense<0.000000e+00> : vector<16xf32>
    %155 = vector.multi_reduction <add>, %154, %cst_38 [1] : vector<16x32xf32> to vector<16xf32>
    %156 = vector.shape_cast %155 : vector<16xf32> to vector<16x1xf32>
    %cst_39 = arith.constant 3.200000e+01 : f32
    %157 = vector.broadcast %cst_39 : f32 to vector<16x1xf32>
    %158 = arith.divf %156, %157 : vector<16x1xf32>
    %159 = vector.broadcast %151 : vector<16x1xf32> to vector<16x32xf32>
    %160 = arith.subf %147, %159 : vector<16x32xf32>
    %cst_40 = arith.constant 9.99999974E-6 : f32
    %161 = vector.broadcast %cst_40 : f32 to vector<16x1xf32>
    %162 = arith.addf %158, %161 : vector<16x1xf32>
    %163 = math.rsqrt %162 : vector<16x1xf32>
    %164 = vector.broadcast %163 : vector<16x1xf32> to vector<16x32xf32>
    %165 = arith.mulf %160, %164 : vector<16x32xf32>
    %166 = vector.broadcast %22 : vector<1x32xf32> to vector<16x32xf32>
    %167 = arith.mulf %165, %166 : vector<16x32xf32>
    %168 = vector.broadcast %23 : vector<1x32xf32> to vector<16x32xf32>
    %169 = arith.addf %167, %168 : vector<16x32xf32>
    %c1 = arith.constant 1 : index
    %c0_41 = arith.constant 0 : index
    %c0_42 = arith.constant 0 : index
    %170 = vector.load %arg3[%c1, %c0_41, %c0_42] : memref<2x16x64xf32, #tpu.memory_space<vmem>>, vector<1x16x64xf32>
    %171 = vector.shape_cast %170 : vector<1x16x64xf32> to vector<16x64xf32>
    %172 = vector.extract_strided_slice %171 {offsets = [0, 0], sizes = [1, 4], strides = [1, 1]} : vector<16x64xf32> to vector<1x4xf32>
    %173 = vector.extract_strided_slice %171 {offsets = [1, 0], sizes = [1, 64], strides = [1, 1]} : vector<16x64xf32> to vector<1x64xf32>
    %174 = vector.extract_strided_slice %171 {offsets = [2, 0], sizes = [1, 32], strides = [1, 1]} : vector<16x64xf32> to vector<1x32xf32>
    %175 = vector.extract_strided_slice %171 {offsets = [3, 0], sizes = [1, 32], strides = [1, 1]} : vector<16x64xf32> to vector<1x32xf32>
    %176 = vector.extract_strided_slice %171 {offsets = [4, 0], sizes = [1, 32], strides = [1, 1]} : vector<16x64xf32> to vector<1x32xf32>
    %177 = vector.extract_strided_slice %171 {offsets = [5, 0], sizes = [1, 32], strides = [1, 1]} : vector<16x64xf32> to vector<1x32xf32>
    %178 = vector.extract_strided_slice %171 {offsets = [6, 0], sizes = [1, 32], strides = [1, 1]} : vector<16x64xf32> to vector<1x32xf32>
    %179 = vector.extract_strided_slice %171 {offsets = [8, 0], sizes = [4, 32], strides = [1, 1]} : vector<16x64xf32> to vector<4x32xf32>
    %cst_43 = arith.constant dense<0.000000e+00> : vector<2x32xf32>
    %180 = tpu.matmul %14, %169, %cst_43 {dimension_numbers = #tpu.dot_dimension_numbers<[1], [0], [0], [1], [0, 0, 1, 1], [], []>} : vector<2x16xf32>, vector<16x32xf32>, vector<2x32xf32> -> vector<2x32xf32>
    %cst_44 = arith.constant dense<0.000000e+00> : vector<2x4xf32>
    %181 = tpu.matmul %180, %179, %cst_44 {dimension_numbers = #tpu.dot_dimension_numbers<[1], [1], [0], [0], [0, 0, 1, 0], [], []>} : vector<2x32xf32>, vector<4x32xf32>, vector<2x4xf32> -> vector<2x4xf32>
    %182 = vector.broadcast %172 : vector<1x4xf32> to vector<2x4xf32>
    %183 = arith.addf %181, %182 : vector<2x4xf32>
    %cst_45 = arith.constant dense<0xFF800000> : vector<2xf32>
    %184 = vector.multi_reduction <maximumf>, %183, %cst_45 [1] : vector<2x4xf32> to vector<2xf32>
    %185 = vector.shape_cast %184 : vector<2xf32> to vector<2x1xf32>
    %186 = vector.broadcast %185 : vector<2x1xf32> to vector<2x4xf32>
    %187 = arith.subf %183, %186 : vector<2x4xf32>
    %188 = math.exp %187 : vector<2x4xf32>
    %cst_46 = arith.constant dense<0.000000e+00> : vector<2xf32>
    %189 = vector.multi_reduction <add>, %188, %cst_46 [1] : vector<2x4xf32> to vector<2xf32>
    %190 = vector.shape_cast %189 : vector<2xf32> to vector<2x1xf32>
    %191 = tpu.reciprocal %190 : vector<2x1xf32> -> vector<2x1xf32>
    %192 = vector.broadcast %191 : vector<2x1xf32> to vector<2x4xf32>
    %193 = arith.mulf %188, %192 : vector<2x4xf32>
    %cst_47 = arith.constant 0.000000e+00 : f32
    %194 = vector.broadcast %cst_47 : f32 to vector<2x4xf32>
    %195 = vector.extract_strided_slice %193 {offsets = [0, 0], sizes = [2, 1], strides = [1, 1]} : vector<2x4xf32> to vector<2x1xf32>
    %196 = vector.broadcast %195 : vector<2x1xf32> to vector<2x4xf32>
    %197 = arith.cmpf ogt, %196, %193 : vector<2x4xf32>
    %198 = arith.extui %197 : vector<2x4xi1> to vector<2x4xi32>
    %199 = arith.sitofp %198 : vector<2x4xi32> to vector<2x4xf32>
    %200 = arith.addf %194, %199 : vector<2x4xf32>
    %201 = vector.extract_strided_slice %193 {offsets = [0, 1], sizes = [2, 1], strides = [1, 1]} : vector<2x4xf32> to vector<2x1xf32>
    %202 = vector.broadcast %201 : vector<2x1xf32> to vector<2x4xf32>
    %203 = arith.cmpf ogt, %202, %193 : vector<2x4xf32>
    %204 = arith.extui %203 : vector<2x4xi1> to vector<2x4xi32>
    %205 = arith.sitofp %204 : vector<2x4xi32> to vector<2x4xf32>
    %206 = arith.addf %200, %205 : vector<2x4xf32>
    %207 = vector.extract_strided_slice %193 {offsets = [0, 2], sizes = [2, 1], strides = [1, 1]} : vector<2x4xf32> to vector<2x1xf32>
    %208 = vector.broadcast %207 : vector<2x1xf32> to vector<2x4xf32>
    %209 = arith.cmpf ogt, %208, %193 : vector<2x4xf32>
    %210 = arith.extui %209 : vector<2x4xi1> to vector<2x4xi32>
    %211 = arith.sitofp %210 : vector<2x4xi32> to vector<2x4xf32>
    %212 = arith.addf %206, %211 : vector<2x4xf32>
    %213 = vector.extract_strided_slice %193 {offsets = [0, 3], sizes = [2, 1], strides = [1, 1]} : vector<2x4xf32> to vector<2x1xf32>
    %214 = vector.broadcast %213 : vector<2x1xf32> to vector<2x4xf32>
    %215 = arith.cmpf ogt, %214, %193 : vector<2x4xf32>
    %216 = arith.extui %215 : vector<2x4xi1> to vector<2x4xi32>
    %217 = arith.sitofp %216 : vector<2x4xi32> to vector<2x4xf32>
    %218 = arith.addf %212, %217 : vector<2x4xf32>
    %cst_48 = arith.constant 2.000000e+00 : f32
    %219 = vector.broadcast %cst_48 : f32 to vector<2x4xf32>
    %220 = arith.cmpf olt, %218, %219 : vector<2x4xf32>
    %cst_49 = arith.constant 0.000000e+00 : f32
    %221 = vector.broadcast %cst_49 : f32 to vector<2x4xf32>
    %222 = arith.select %220, %193, %221 : vector<2x4xi1>, vector<2x4xf32>
    %cst_50 = arith.constant dense<0.000000e+00> : vector<2xf32>
    %223 = vector.multi_reduction <add>, %222, %cst_50 [1] : vector<2x4xf32> to vector<2xf32>
    %224 = vector.shape_cast %223 : vector<2xf32> to vector<2x1xf32>
    %225 = tpu.reciprocal %224 : vector<2x1xf32> -> vector<2x1xf32>
    %226 = vector.broadcast %225 : vector<2x1xf32> to vector<2x4xf32>
    %227 = arith.mulf %222, %226 : vector<2x4xf32>
    %c1_51 = arith.constant 1 : index
    %c0_52 = arith.constant 0 : index
    %c0_53 = arith.constant 0 : index
    %c0_54 = arith.constant 0 : index
    %228 = vector.load %arg1[%c1_51, %c0_52, %c0_53, %c0_54] : memref<2x16x32x8xf32, #tpu.memory_space<vmem>>, vector<1x16x32x8xf32>
    %229 = vector.shape_cast %228 : vector<1x16x32x8xf32> to vector<16x32x8xf32>
    %230 = vector.extract_strided_slice %229 {offsets = [0, 0, 0], sizes = [12, 32, 8], strides = [1, 1, 1]} : vector<16x32x8xf32> to vector<12x32x8xf32>
    %231 = vector.extract_strided_slice %229 {offsets = [12, 0, 0], sizes = [4, 32, 8], strides = [1, 1, 1]} : vector<16x32x8xf32> to vector<4x32x8xf32>
    %232 = vector.shape_cast %169 : vector<16x32xf32> to vector<1x16x32xf32>
    %233 = vector.broadcast %232 : vector<1x16x32xf32> to vector<12x16x32xf32>
    %cst_55 = arith.constant dense<0.000000e+00> : vector<12x16x8xf32>
    %234 = tpu.matmul %233, %230, %cst_55 {dimension_numbers = #tpu.dot_dimension_numbers<[2], [1], [1], [2], [0, 0, 0, 1, 1, 2], [0], [0]>} : vector<12x16x32xf32>, vector<12x32x8xf32>, vector<12x16x8xf32> -> vector<12x16x8xf32>
    %235 = vector.extract_strided_slice %234 {offsets = [0, 0, 0], sizes = [4, 16, 8], strides = [1, 1, 1]} : vector<12x16x8xf32> to vector<4x16x8xf32>
    %236 = vector.shape_cast %235 : vector<4x16x8xf32> to vector<8x8x8xf32>
    %237 = vector.extract_strided_slice %234 {offsets = [4, 0, 0], sizes = [4, 16, 8], strides = [1, 1, 1]} : vector<12x16x8xf32> to vector<4x16x8xf32>
    %238 = vector.shape_cast %237 : vector<4x16x8xf32> to vector<8x8x8xf32>
    %239 = vector.extract_strided_slice %234 {offsets = [8, 0, 0], sizes = [4, 16, 8], strides = [1, 1, 1]} : vector<12x16x8xf32> to vector<4x16x8xf32>
    %240 = vector.shape_cast %239 : vector<4x16x8xf32> to vector<8x8x8xf32>
    %cst_56 = arith.constant dense<0.000000e+00> : vector<8x8x8xf32>
    %241 = tpu.matmul %236, %238, %cst_56 {dimension_numbers = #tpu.dot_dimension_numbers<[2], [2], [1], [1], [0, 0, 0, 1, 1, 1], [0], [0]>} : vector<8x8x8xf32>, vector<8x8x8xf32>, vector<8x8x8xf32> -> vector<8x8x8xf32>
    %cst_57 = arith.constant 0.353553385 : f32
    %242 = vector.broadcast %cst_57 : f32 to vector<8x8x8xf32>
    %243 = arith.mulf %241, %242 : vector<8x8x8xf32>
    %cst_58 = arith.constant dense<0xFF800000> : vector<8x8xf32>
    %244 = vector.multi_reduction <maximumf>, %243, %cst_58 [2] : vector<8x8x8xf32> to vector<8x8xf32>
    %245 = vector.shape_cast %244 : vector<8x8xf32> to vector<8x8x1xf32>
    %246 = vector.broadcast %245 : vector<8x8x1xf32> to vector<8x8x8xf32>
    %247 = arith.subf %243, %246 : vector<8x8x8xf32>
    %248 = math.exp %247 : vector<8x8x8xf32>
    %cst_59 = arith.constant dense<0.000000e+00> : vector<8x8xf32>
    %249 = vector.multi_reduction <add>, %248, %cst_59 [2] : vector<8x8x8xf32> to vector<8x8xf32>
    %250 = vector.shape_cast %249 : vector<8x8xf32> to vector<8x8x1xf32>
    %251 = tpu.reciprocal %250 : vector<8x8x1xf32> -> vector<8x8x1xf32>
    %252 = vector.broadcast %251 : vector<8x8x1xf32> to vector<8x8x8xf32>
    %253 = arith.mulf %248, %252 : vector<8x8x8xf32>
    %cst_60 = arith.constant dense<0.000000e+00> : vector<8x8x8xf32>
    %254 = tpu.matmul %253, %240, %cst_60 {dimension_numbers = #tpu.dot_dimension_numbers<[2], [1], [1], [2], [0, 0, 0, 1, 1, 2], [0], [0]>} : vector<8x8x8xf32>, vector<8x8x8xf32>, vector<8x8x8xf32> -> vector<8x8x8xf32>
    %255 = vector.shape_cast %231 : vector<4x32x8xf32> to vector<4x1x32x8xf32>
    %256 = vector.shape_cast %255 : vector<4x1x32x8xf32> to vector<4x1x32x8xf32>
    %257 = vector.broadcast %256 : vector<4x1x32x8xf32> to vector<4x2x32x8xf32>
    %258 = vector.shape_cast %257 : vector<4x2x32x8xf32> to vector<8x32x8xf32>
    %cst_61 = arith.constant dense<0.000000e+00> : vector<8x8x32xf32>
    %259 = tpu.matmul %254, %258, %cst_61 {dimension_numbers = #tpu.dot_dimension_numbers<[2], [2], [1], [1], [0, 0, 0, 1, 1, 1], [0], [0]>} : vector<8x8x8xf32>, vector<8x32x8xf32>, vector<8x8x32xf32> -> vector<8x8x32xf32>
    %260 = vector.shape_cast %259 : vector<8x8x32xf32> to vector<4x2x8x32xf32>
    %261 = tpu.transpose %260, [1, 0, 2, 3] : vector<4x2x8x32xf32> -> vector<2x4x8x32xf32>
    %262 = vector.shape_cast %227 : vector<2x4xf32> to vector<2x4x1x1xf32>
    %263 = vector.broadcast %262 : vector<2x4x1x1xf32> to vector<2x4x8x32xf32>
    %264 = arith.mulf %261, %263 : vector<2x4x8x32xf32>
    %cst_62 = arith.constant dense<0.000000e+00> : vector<2x8x32xf32>
    %265 = vector.multi_reduction <add>, %264, %cst_62 [1] : vector<2x4x8x32xf32> to vector<2x8x32xf32>
    %266 = vector.shape_cast %265 : vector<2x8x32xf32> to vector<16x32xf32>
    %267 = arith.addf %169, %266 : vector<16x32xf32>
    %cst_63 = arith.constant dense<0.000000e+00> : vector<16xf32>
    %268 = vector.multi_reduction <add>, %267, %cst_63 [1] : vector<16x32xf32> to vector<16xf32>
    %269 = vector.shape_cast %268 : vector<16xf32> to vector<16x1xf32>
    %cst_64 = arith.constant 3.200000e+01 : f32
    %270 = vector.broadcast %cst_64 : f32 to vector<16x1xf32>
    %271 = arith.divf %269, %270 : vector<16x1xf32>
    %272 = vector.broadcast %271 : vector<16x1xf32> to vector<16x32xf32>
    %273 = arith.subf %267, %272 : vector<16x32xf32>
    %274 = arith.mulf %273, %273 : vector<16x32xf32>
    %cst_65 = arith.constant dense<0.000000e+00> : vector<16xf32>
    %275 = vector.multi_reduction <add>, %274, %cst_65 [1] : vector<16x32xf32> to vector<16xf32>
    %276 = vector.shape_cast %275 : vector<16xf32> to vector<16x1xf32>
    %cst_66 = arith.constant 3.200000e+01 : f32
    %277 = vector.broadcast %cst_66 : f32 to vector<16x1xf32>
    %278 = arith.divf %276, %277 : vector<16x1xf32>
    %279 = vector.broadcast %271 : vector<16x1xf32> to vector<16x32xf32>
    %280 = arith.subf %267, %279 : vector<16x32xf32>
    %cst_67 = arith.constant 9.99999974E-6 : f32
    %281 = vector.broadcast %cst_67 : f32 to vector<16x1xf32>
    %282 = arith.addf %278, %281 : vector<16x1xf32>
    %283 = math.rsqrt %282 : vector<16x1xf32>
    %284 = vector.broadcast %283 : vector<16x1xf32> to vector<16x32xf32>
    %285 = arith.mulf %280, %284 : vector<16x32xf32>
    %286 = vector.broadcast %175 : vector<1x32xf32> to vector<16x32xf32>
    %287 = arith.mulf %285, %286 : vector<16x32xf32>
    %288 = vector.broadcast %176 : vector<1x32xf32> to vector<16x32xf32>
    %289 = arith.addf %287, %288 : vector<16x32xf32>
    %c1_68 = arith.constant 1 : index
    %c0_69 = arith.constant 0 : index
    %c0_70 = arith.constant 0 : index
    %290 = vector.load %arg2[%c1_68, %c0_69, %c0_70] : memref<2x96x64xf32, #tpu.memory_space<vmem>>, vector<1x96x64xf32>
    %291 = vector.shape_cast %290 : vector<1x96x64xf32> to vector<96x64xf32>
    %292 = vector.extract_strided_slice %291 {offsets = [0, 0], sizes = [32, 64], strides = [1, 1]} : vector<96x64xf32> to vector<32x64xf32>
    %293 = vector.extract_strided_slice %291 {offsets = [32, 0], sizes = [64, 32], strides = [1, 1]} : vector<96x64xf32> to vector<64x32xf32>
    %cst_71 = arith.constant dense<0.000000e+00> : vector<16x64xf32>
    %294 = tpu.matmul %289, %292, %cst_71 {dimension_numbers = #tpu.dot_dimension_numbers<[1], [0], [0], [1], [0, 0, 1, 1], [], []>} : vector<16x32xf32>, vector<32x64xf32>, vector<16x64xf32> -> vector<16x64xf32>
    %295 = vector.broadcast %173 : vector<1x64xf32> to vector<16x64xf32>
    %296 = arith.addf %294, %295 : vector<16x64xf32>
    %cst_72 = arith.constant 0.000000e+00 : f32
    %297 = vector.broadcast %cst_72 : f32 to vector<16x64xf32>
    %298 = arith.maximumf %296, %297 : vector<16x64xf32>
    %cst_73 = arith.constant dense<0.000000e+00> : vector<16x32xf32>
    %299 = tpu.matmul %298, %293, %cst_73 {dimension_numbers = #tpu.dot_dimension_numbers<[1], [0], [0], [1], [0, 0, 1, 1], [], []>} : vector<16x64xf32>, vector<64x32xf32>, vector<16x32xf32> -> vector<16x32xf32>
    %300 = vector.broadcast %174 : vector<1x32xf32> to vector<16x32xf32>
    %301 = arith.addf %299, %300 : vector<16x32xf32>
    %302 = arith.addf %289, %301 : vector<16x32xf32>
    %cst_74 = arith.constant dense<0.000000e+00> : vector<16xf32>
    %303 = vector.multi_reduction <add>, %302, %cst_74 [1] : vector<16x32xf32> to vector<16xf32>
    %304 = vector.shape_cast %303 : vector<16xf32> to vector<16x1xf32>
    %cst_75 = arith.constant 3.200000e+01 : f32
    %305 = vector.broadcast %cst_75 : f32 to vector<16x1xf32>
    %306 = arith.divf %304, %305 : vector<16x1xf32>
    %307 = vector.broadcast %306 : vector<16x1xf32> to vector<16x32xf32>
    %308 = arith.subf %302, %307 : vector<16x32xf32>
    %309 = arith.mulf %308, %308 : vector<16x32xf32>
    %cst_76 = arith.constant dense<0.000000e+00> : vector<16xf32>
    %310 = vector.multi_reduction <add>, %309, %cst_76 [1] : vector<16x32xf32> to vector<16xf32>
    %311 = vector.shape_cast %310 : vector<16xf32> to vector<16x1xf32>
    %cst_77 = arith.constant 3.200000e+01 : f32
    %312 = vector.broadcast %cst_77 : f32 to vector<16x1xf32>
    %313 = arith.divf %311, %312 : vector<16x1xf32>
    %314 = vector.broadcast %306 : vector<16x1xf32> to vector<16x32xf32>
    %315 = arith.subf %302, %314 : vector<16x32xf32>
    %cst_78 = arith.constant 9.99999974E-6 : f32
    %316 = vector.broadcast %cst_78 : f32 to vector<16x1xf32>
    %317 = arith.addf %313, %316 : vector<16x1xf32>
    %318 = math.rsqrt %317 : vector<16x1xf32>
    %319 = vector.broadcast %318 : vector<16x1xf32> to vector<16x32xf32>
    %320 = arith.mulf %315, %319 : vector<16x32xf32>
    %321 = vector.broadcast %177 : vector<1x32xf32> to vector<16x32xf32>
    %322 = arith.mulf %320, %321 : vector<16x32xf32>
    %323 = vector.broadcast %178 : vector<1x32xf32> to vector<16x32xf32>
    %324 = arith.addf %322, %323 : vector<16x32xf32>
    %325 = vector.shape_cast %324 : vector<16x32xf32> to vector<2x8x32xf32>
    %c0_79 = arith.constant 0 : index
    %c0_80 = arith.constant 0 : index
    %c0_81 = arith.constant 0 : index
    %326 = vector.load %arg4[%c0_79, %c0_80, %c0_81] : memref<2x8x32xf32, #tpu.memory_space<vmem>>, vector<2x8x32xf32>
    tpu.vector_store %arg4[%c0_79, %c0_80, %c0_81], %325 {strides = array<i32>} : memref<2x8x32xf32, #tpu.memory_space<vmem>>, vector<2x8x32xf32>,
    return
  }
}

</mosaic_0001>

<bundles_post_ra>
// kernel: sparse_transformer_forward.1
= control target key start
LH: loop header
LB: loop body
LE: loop exit
PB: predicated region body
PF: predicated region fallthrough
CT: control target
= control target key end

     0   :  { %v20_v2 = vlaneseq  ;;  %v8714_v3 = vmov 0.0|0.0   ;;  %vm8715_vm0 = vmmov 0   ;;  %v8716_v5 = vmov 0.0   ;;  %s9934_s0 = inlined_call_operand.vmem [shape: f32[2,8,32], index: 0, kind: input, shape index: {}]   ;;  %s9935_s1 = inlined_call_operand.vmem [shape: f32[2,16,32,8], index: 1, kind: input, shape index: {}]   ;;  %s9936_s2 = inlined_call_operand.vmem [shape: f32[2,96,64], index: 2, kind: input, shape index: {}]   ;;  %s9937_s3 = inlined_call_operand.vmem [shape: f32[2,16,64], index: 3, kind: input, shape index: {}]   ;;  %s9938_s4 = inlined_call_operand.hbm [shape: f32[2,8,32], index: 4, kind: output, shape index: {}]  }
   0x1   :  { %v8752_v0 = vld [vmem:[%s9934_s0] sm:$0xff]  ;;  %v8757_v1 = vld [vmem:[%s9934_s0 + $0x8] sm:$0xff]  ;;  %8203 = vmatprep.subr.bf16.mxu0 %v8714_v3  ;;  %7523 = vmatprep.mubr.msk.f32.mxu0 %vm8715_vm0, %v8716_v5  ;;  %vm112_vm1 = vcmask 261120  }
   0x2   :  { %v8204_v4 = vpack.c.bf16 %v8757_v1, %v8752_v0 }
   0x3   :  { %9 = vsyncpa [#allocation3], 0  ;;  %v8764_v6 = vshrl.u32 %v20_v2, 7  ;;  %v23_v7 = vand.u32 127, %v20_v2  ;;  %7550 = vmatprep.mubr.msk.f32.mxu1 %vm112_vm1, %v8752_v0  ;;  %vm34_vm4 = vcmask 130048   ;;  %v33_v11 = vld [vmem:[%s9937_s3 + $0x8] sm:$0xff] }
   0x4   :  { %8205 = vmatpush3.bf16.msra.mxu0 %v8204_v4  ;;  %v241_v13 = vld [vmem:[%s9935_s1] sm:$0xff]  ;;  %v242_v14 = vld [vmem:[%s9935_s1 + $0x8] sm:$0xff]  ;;  %v247_v19 = vld [vmem:[%s9935_s1 + $0x30] sm:$0xff]  ;;  %vm1211_vm6 = vcmask 64512   ;;  %vm189_vm7 = vcmask 25600   ;;  %vm3344_vm14 = vcmask 523264  }
   0x5   :  { %v24_v8 = vmul.u32 8, %v8764_v6  ;;  %v26_v9 = vadd.s32 1, %v8764_v6  ;;  %7526 = vmatprep.subr.mxu0 %v8716_v5  ;;  %v8206_v15 = vpack.c.bf16 %v242_v14, %v241_v13  ;;  %v245_v16 = vld [vmem:[%s9935_s1 + $0x20] sm:$0xff]  ;;  %v246_v17 = vld [vmem:[%s9935_s1 + $0x28] sm:$0xff]  ;;  %v248_v20 = vld [vmem:[%s9935_s1 + $0x38] sm:$0xff] }
   0x6   :  { %v8214_v18 = vpack.c.bf16 %v246_v17, %v245_v16  ;;  %v8218_v21 = vpack.c.bf16 %v248_v20, %v247_v19  ;;  %v253_v22 = vld [vmem:[%s9935_s1 + $0x60] sm:$0xff]  ;;  %v254_v23 = vld [vmem:[%s9935_s1 + $0x68] sm:$0xff]  ;;  %v255_v25 = vld [vmem:[%s9935_s1 + $0x70] sm:$0xff] }
   0x7   :  { %vm25_vm2 = vcmp.ge.s32.totalorder %v23_v7, %v24_v8  ;;  %v27_v10 = vmul.u32 8, %v26_v9  ;;  %v8230_v24 = vpack.c.bf16 %v254_v23, %v253_v22  ;;  %v256_v26 = vld [vmem:[%s9935_s1 + $0x78] sm:$0xff]  ;;  %v261_v28 = vld [vmem:[%s9935_s1 + $0xa0] sm:$0xff]  ;;  %v262_v29 = vld [vmem:[%s9935_s1 + $0xa8] sm:$0xff] }
   0x8   :  { %8215 = vmatprep.subr.bf16.mxu1 %v8214_v18  ;;  %v8234_v27 = vpack.c.bf16 %v256_v26, %v255_v25  ;;  %v8246_v30 = vpack.c.bf16 %v262_v29, %v261_v28  ;;  %v263_v31 = vld [vmem:[%s9935_s1 + $0xb0] sm:$0xff]  ;;  %v264_v32 = vld [vmem:[%s9935_s1 + $0xb8] sm:$0xff]  ;;  %v269_v34 = vld [vmem:[%s9935_s1 + $0xe0] sm:$0xff] }
   0x9   :  { %vm28_vm3 = vcmp.lt.s32.totalorder %v23_v7, %v27_v10  ;;  %8217 = vmatpush3.bf16.msra.mxu1 %v8214_v18  ;;  %v8250_v33 = vpack.c.bf16 %v264_v32, %v263_v31  ;;  %v270_v35 = vld [vmem:[%s9935_s1 + $0xe8] sm:$0xff]  ;;  %v271_v37 = vld [vmem:[%s9935_s1 + $0xf0] sm:$0xff]  ;;  %v272_v38 = vld [vmem:[%s9935_s1 + $0xf8] sm:$0xff] }
   0xa   :  { %vm29_vm5 = vmand %vm25_vm2, %vm28_vm3  ;;  %8219 = vmatprep.subr.bf16.mxu1 %v8218_v21  ;;  %v8262_v36 = vpack.c.bf16 %v270_v35, %v269_v34  ;;  %v8266_v39 = vpack.c.bf16 %v272_v38, %v271_v37  ;;  %v243_v40 = vld [vmem:[%s9935_s1 + $0x10] sm:$0xff]  ;;  %v244_v41 = vld [vmem:[%s9935_s1 + $0x18] sm:$0xff] }
   0xb   :  { %v8775_v12 = vsel %vm29_vm5, 1.0, %v8716_v5  ;;  %v8210_v42 = vpack.c.bf16 %v244_v41, %v243_v40  ;;  %v249_v44 = vld [vmem:[%s9935_s1 + $0x40] sm:$0xff]  ;;  %v250_v45 = vld [vmem:[%s9935_s1 + $0x48] sm:$0xff]  ;;  %v251_v48 = vld [vmem:[%s9935_s1 + $0x50] sm:$0xff] }
   0xc   :  { %7524 = vmatmul.mubr.msk.f32.vlgmr.msra.gmra.mrb[0].mxu0 %vm34_vm4, %v8775_v12  ;;  %v8222_v47 = vpack.c.bf16 %v250_v45, %v249_v44  ;;  %v252_v49 = vld [vmem:[%s9935_s1 + $0x58] sm:$0xff]  ;;  %v257_v51 = vld [vmem:[%s9935_s1 + $0x80] sm:$0xff]  ;;  %v258_v52 = vld [vmem:[%s9935_s1 + $0x88] sm:$0xff] }
   0xd   :  { %7527 = vmatpush3.xpose.msk.msra.mxu0 %vm112_vm1, %v33_v11  ;;  %7528 = vmatprep.mubr.msk.f32.mxu0 %vm8715_vm0, %v8716_v5  ;;  %v8226_v50 = vpack.c.bf16 %v252_v49, %v251_v48  ;;  %v8238_v53 = vpack.c.bf16 %v258_v52, %v257_v51  ;;  %v259_v54 = vld [vmem:[%s9935_s1 + $0x90] sm:$0xff]  ;;  %v260_v55 = vld [vmem:[%s9935_s1 + $0x98] sm:$0xff]  ;;  %v265_v57 = vld [vmem:[%s9935_s1 + $0xc0] sm:$0xff] }
   0xe   :  { %8207 = vmatprep.subr.bf16.mxu0 %v8206_v15  ;;  %8221 = vmatpush3.bf16.msra.mxu1 %v8218_v21  ;;  %v8242_v56 = vpack.c.bf16 %v260_v55, %v259_v54  ;;  %v266_v58 = vld [vmem:[%s9935_s1 + $0xc8] sm:$0xff]  ;;  %v267_v60 = vld [vmem:[%s9935_s1 + $0xd0] sm:$0xff]  ;;  %v268_v61 = vld [vmem:[%s9935_s1 + $0xd8] sm:$0xff] }
   0xf   :  { %8231 = vmatprep.subr.bf16.mxu1 %v8230_v24  ;;  %v8254_v59 = vpack.c.bf16 %v266_v58, %v265_v57  ;;  %v8258_v62 = vpack.c.bf16 %v268_v61, %v267_v60  ;;  %v277_v63 = vld [vmem:[%s9935_s1 + $0x120] sm:$0xff]  ;;  %v278_v2 = vld [vmem:[%s9935_s1 + $0x128] sm:$0xff]  ;;  %v279_v9 = vld [vmem:[%s9935_s1 + $0x130] sm:$0xff] }
  0x10   :  { %v8278_v4 = vpack.c.bf16 %v278_v2, %v277_v63  ;;  %v273_v7 = vld [vmem:[%s9935_s1 + $0x100] sm:$0xff]  ;;  %v274_v8 = vld [vmem:[%s9935_s1 + $0x108] sm:$0xff]  ;;  %v280_v11 = vld [vmem:[%s9935_s1 + $0x138] sm:$0xff] }
  0x11   :  { %7551 = vmatmul.mubr.msk.f32.vlgmr.msra.gmra.mrb[0].mxu1 %vm112_vm1, %v8757_v1  ;;  %v8270_v10 = vpack.c.bf16 %v274_v8, %v273_v7  ;;  %v8282_v13 = vpack.c.bf16 %v280_v11, %v279_v9  ;;  %v275_v14 = vld [vmem:[%s9935_s1 + $0x110] sm:$0xff]  ;;  %v285_v17 = vld [vmem:[%s9935_s1 + $0x160] sm:$0xff]  ;;  %v286_v18 = vld [vmem:[%s9935_s1 + $0x168] sm:$0xff] }
  0x12   :  { %8233 = vmatpush3.bf16.msra.mxu1 %v8230_v24  ;;  %7572 = vmatprep.mubr.msk.f32.mxu1 %vm112_vm1, %v8752_v0  ;;  %v8294_v19 = vpack.c.bf16 %v286_v18, %v285_v17  ;;  %v281_v20 = vld [vmem:[%s9935_s1 + $0x140] sm:$0xff]  ;;  %v282_v21 = vld [vmem:[%s9935_s1 + $0x148] sm:$0xff]  ;;  %v287_v22 = vld [vmem:[%s9935_s1 + $0x170] sm:$0xff] }
  0x13   :  { %8235 = vmatprep.subr.bf16.mxu1 %v8234_v27  ;;  %v8286_v23 = vpack.c.bf16 %v282_v21, %v281_v20  ;;  %v288_v24 = vld [vmem:[%s9935_s1 + $0x178] sm:$0xff]  ;;  %v283_v28 = vld [vmem:[%s9935_s1 + $0x150] sm:$0xff]  ;;  %vm9112_vm8 = vmpackc.low %vm1211_vm6, %vm1211_vm6 }
  0x14   :  { %v8298_v26 = vpack.c.bf16 %v288_v24, %v287_v22  ;;  %v284_v29 = vld [vmem:[%s9935_s1 + $0x158] sm:$0xff] }
  0x16   :  { %8237 = vmatpush3.bf16.msra.mxu1 %v8234_v27 }
  0x17   :  { %8247 = vmatprep.subr.bf16.mxu1 %v8246_v30 }
  0x19   :  { %7573 = vmatmul.mubr.msk.f32.vlgmr.msra.gmra.mrb[2].mxu1 %vm112_vm1, %v8757_v1 }
  0x1a   :  { %8249 = vmatpush3.bf16.msra.mxu1 %v8246_v30  ;;  %7594 = vmatprep.mubr.msk.f32.mxu1 %vm112_vm1, %v8752_v0  ;;  %v8290_v30 = vpack.c.bf16 %v284_v29, %v283_v28 }
  0x1b   :  { %8251 = vmatprep.subr.bf16.mxu1 %v8250_v33 }
  0x1e   :  { %8253 = vmatpush3.bf16.msra.mxu1 %v8250_v33 }
  0x1f   :  { %8263 = vmatprep.subr.bf16.mxu1 %v8262_v36 }
  0x21   :  { %7595 = vmatmul.mubr.msk.f32.vlgmr.msra.gmra.mrb[4].mxu1 %vm112_vm1, %v8757_v1 }
  0x22   :  { %8265 = vmatpush3.bf16.msra.mxu1 %v8262_v36  ;;  %7616 = vmatprep.mubr.msk.f32.mxu1 %vm112_vm1, %v8752_v0 }
  0x23   :  { %8267 = vmatprep.subr.bf16.mxu1 %v8266_v39 }
  0x26   :  { %8269 = vmatpush3.bf16.msra.mxu1 %v8266_v39 }
  0x27   :  { %8279 = vmatprep.subr.bf16.mxu1 %v8278_v4 }
  0x29   :  { %7617 = vmatmul.mubr.msk.f32.vlgmr.msra.gmra.mrb[6].mxu1 %vm112_vm1, %v8757_v1 }
  0x2a   :  { %7638 = vmatprep.mubr.msk.f32.mxu1 %vm112_vm1, %v8752_v0  ;;  %8281 = vmatpush3.bf16.msra.mxu1 %v8278_v4 }
  0x2b   :  { %8283 = vmatprep.subr.bf16.mxu1 %v8282_v13 }
  0x2e   :  { %8285 = vmatpush3.bf16.msra.mxu1 %v8282_v13 }
  0x2f   :  { %8295 = vmatprep.subr.bf16.mxu1 %v8294_v19 }
  0x31   :  { %7639 = vmatmul.mubr.msk.f32.vlgmr.msra.gmra.mrb[8].mxu1 %vm112_vm1, %v8757_v1 }
  0x32   :  { %8297 = vmatpush3.bf16.msra.mxu1 %v8294_v19  ;;  %7660 = vmatprep.mubr.msk.f32.mxu1 %vm112_vm1, %v8752_v0 }
  0x33   :  { %8299 = vmatprep.subr.bf16.mxu1 %v8298_v26 }
  0x36   :  { %8301 = vmatpush3.bf16.msra.mxu1 %v8298_v26 }
  0x37   :  { %7668 = vmatprep.subr.mxu1 %v8716_v5 }
  0x39   :  { %7661 = vmatmul.mubr.msk.f32.vlgmr.msra.gmra.mrb[10].mxu1 %vm112_vm1, %v8757_v1 }
  0x3a   :  { %7670 = vmatprep.mubr.msk.f32.mxu1 %vm8715_vm0, %v8716_v5 }
  0xdf   :  { %v104_v43 = vpop.f32.mrb[0].mxu0 }
  0xe0   :  { %v7525_v46 = vpop.f32.mrb[1].mxu0  ;;  %7529 = vmatmul.mubr.msk.f32.vlgmr.msra.gmra.mrb[2].mxu0 %vm112_vm1, %v104_v43 }
  0xe1   :  { %8209 = vmatpush3.bf16.msra.mxu0 %v8206_v15  ;;  %7539 = vmatprep.mubr.msk.f32.mxu0 %vm112_vm1, %v8752_v0  ;;  %v276_v15 = vld [vmem:[%s9935_s1 + $0x118] sm:$0xff] }
  0xe2   :  { %8211 = vmatprep.subr.bf16.mxu0 %v8210_v42  ;;  %v8274_v16 = vpack.c.bf16 %v276_v15, %v275_v14 }
  0xe4   :  { %v7552_v25 = vpop.f32.mrb[0].mxu1 }
  0xe5   :  { %8213 = vmatpush3.bf16.msra.mxu0 %v8210_v42  ;;  %v452_v27 = vpop.f32.mrb[1].mxu1 }
  0xe6   :  { %8223 = vmatprep.subr.bf16.mxu0 %v8222_v47 }
  0xe8   :  { %7540 = vmatmul.mubr.msk.f32.vlgmr.msra.gmra.mrb[4].mxu0 %vm112_vm1, %v8757_v1 }
  0xe9   :  { %8225 = vmatpush3.bf16.msra.mxu0 %v8222_v47  ;;  %7561 = vmatprep.mubr.msk.f32.mxu0 %vm112_vm1, %v8752_v0 }
  0xea   :  { %8227 = vmatprep.subr.bf16.mxu0 %v8226_v50 }
  0xec   :  { %v7574_v31 = vpop.f32.mrb[2].mxu1 }
  0xed   :  { %8229 = vmatpush3.bf16.msra.mxu0 %v8226_v50  ;;  %v602_v32 = vpop.f32.mrb[3].mxu1 }
  0xee   :  { %8239 = vmatprep.subr.bf16.mxu0 %v8238_v53 }
  0xf0   :  { %7562 = vmatmul.mubr.msk.f32.vlgmr.msra.gmra.mrb[6].mxu0 %vm112_vm1, %v8757_v1 }
  0xf1   :  { %8241 = vmatpush3.bf16.msra.mxu0 %v8238_v53  ;;  %7583 = vmatprep.mubr.msk.f32.mxu0 %vm112_vm1, %v8752_v0 }
  0xf2   :  { %8243 = vmatprep.subr.bf16.mxu0 %v8242_v56 }
  0xf5   :  { %8245 = vmatpush3.bf16.msra.mxu0 %v8242_v56 }
  0xf6   :  { %8255 = vmatprep.subr.bf16.mxu0 %v8254_v59 }
  0xf8   :  { %7584 = vmatmul.mubr.msk.f32.vlgmr.msra.gmra.mrb[8].mxu0 %vm112_vm1, %v8757_v1 }
  0xf9   :  { %8257 = vmatpush3.bf16.msra.mxu0 %v8254_v59  ;;  %7605 = vmatprep.mubr.msk.f32.mxu0 %vm112_vm1, %v8752_v0 }
  0xfa   :  { %8259 = vmatprep.subr.bf16.mxu0 %v8258_v62 }
  0xfd   :  { %8261 = vmatpush3.bf16.msra.mxu0 %v8258_v62 }
  0xfe   :  { %8271 = vmatprep.subr.bf16.mxu0 %v8270_v10 }
 0x100   :  { %7606 = vmatmul.mubr.msk.f32.vlgmr.msra.gmra.mrb[10].mxu0 %vm112_vm1, %v8757_v1 }
 0x101   :  { %7627 = vmatprep.mubr.msk.f32.mxu0 %vm112_vm1, %v8752_v0  ;;  %8273 = vmatpush3.bf16.msra.mxu0 %v8270_v10 }
 0x102   :  { %8275 = vmatprep.subr.bf16.mxu0 %v8274_v16 }
 0x105   :  { %8277 = vmatpush3.bf16.msra.mxu0 %v8274_v16 }
 0x106   :  { %8287 = vmatprep.subr.bf16.mxu0 %v8286_v23 }
 0x108   :  { %7628 = vmatmul.mubr.msk.f32.vlgmr.msra.gmra.mrb[12].mxu0 %vm112_vm1, %v8757_v1 }
 0x109   :  { %8289 = vmatpush3.bf16.msra.mxu0 %v8286_v23  ;;  %7649 = vmatprep.mubr.msk.f32.mxu0 %vm112_vm1, %v8752_v0  ;;  %v7596_v0 = vpop.f32.mrb[4].mxu1 }
 0x10a   :  { %8291 = vmatprep.subr.bf16.mxu0 %v8290_v30  ;;  %v752_v33 = vpop.f32.mrb[5].mxu1 }
 0x10b   :  { %v7618_v34 = vpop.f32.mrb[6].mxu1 }
 0x10c   :  { %v902_v35 = vpop.f32.mrb[7].mxu1 }
 0x10d   :  { %8293 = vmatpush3.bf16.msra.mxu0 %v8290_v30  ;;  %v9021_v45 = vpop.f32.mrb[8].mxu1 }
 0x10e   :  { %7663 = vmatprep.subr.mxu0 %v8716_v5  ;;  %v9023_v47 = vpop.f32.mrb[9].mxu1 }
 0x10f   :  { %v9029_v50 = vpop.f32.mrb[10].mxu1 }
 0x110   :  { %7650 = vmatmul.mubr.msk.f32.vlgmr.msra.gmra.mrb[14].mxu0 %vm112_vm1, %v8757_v1  ;;  %v9033_v52 = vpop.f32.mrb[11].mxu1 }
 0x111   :  { %7665 = vmatprep.mubr.msk.f32.mxu0 %vm8715_vm0, %v8716_v5 }
 0x1b3   :  { %v8979_v36 = vpop.f32.mrb[2].mxu0 }
 0x1b4   :  { %v7530_v37 = vpop.f32.mrb[3].mxu0 }
 0x1bb   :  { %v7541_v38 = vpop.f32.mrb[4].mxu0 }
 0x1bc   :  { %v377_v39 = vpop.f32.mrb[5].mxu0 }
 0x1c3   :  { %v7563_v40 = vpop.f32.mrb[6].mxu0 }
 0x1c4   :  { %v527_v41 = vpop.f32.mrb[7].mxu0 }
 0x1cb   :  { %v7585_v42 = vpop.f32.mrb[8].mxu0 }
 0x1cc   :  { %v677_v1 = vpop.f32.mrb[9].mxu0  ;;  %7669 = vmatpush3.xpose.msk.msra.mxu1 %vm1211_vm6, %v7585_v42 }
 0x1cd   :  { %7664 = vmatpush3.xpose.msk.msra.mxu0 %vm1211_vm6, %v677_v1  ;;  %7678 = vmatprep.subr.mxu1 %v8716_v5 }
 0x1ce   :  { %7673 = vmatprep.subr.mxu0 %v8716_v5 }
 0x1cf   :  { %7671 = vmatmul.mubr.msk.f32.vlgmr.msra.gmra.mrb[12].mxu1 %vm1211_vm6, %v7541_v38 }
 0x1d0   :  { %7666 = vmatmul.mubr.msk.f32.vlgmr.msra.gmra.mrb[16].mxu0 %vm1211_vm6, %v377_v39  ;;  %7679 = vmatpush3.xpose.msk.msra.mxu1 %vm1211_vm6, %v7596_v0 }
 0x1d1   :  { %7674 = vmatpush3.xpose.msk.msra.mxu0 %vm1211_vm6, %v752_v33  ;;  %7680 = vmatprep.mubr.msk.f32.mxu1 %vm8715_vm0, %v8716_v5 }
 0x1d2   :  { %7675 = vmatprep.mubr.msk.f32.mxu0 %vm8715_vm0, %v8716_v5  ;;  %7688 = vmatprep.subr.mxu1 %v8716_v5 }
 0x1d3   :  { %v7607_v43 = vpop.f32.mrb[10].mxu0  ;;  %7681 = vmatmul.mubr.msk.f32.vlgmr.msra.gmra.mrb[14].mxu1 %vm1211_vm6, %v7552_v25  ;;  %7683 = vmatprep.subr.mxu0 %v8716_v5 }
 0x1d4   :  { %v827_v44 = vpop.f32.mrb[11].mxu0  ;;  %7676 = vmatmul.mubr.msk.f32.vlgmr.msra.gmra.mrb[18].mxu0 %vm1211_vm6, %v452_v27  ;;  %7689 = vmatpush3.xpose.msk.msra.mxu1 %vm1211_vm6, %v7607_v43 }
 0x1d5   :  { %7684 = vmatpush3.xpose.msk.msra.mxu0 %vm1211_vm6, %v827_v44  ;;  %7690 = vmatprep.mubr.msk.f32.mxu1 %vm8715_vm0, %v8716_v5 }
 0x1d6   :  { %7685 = vmatprep.mubr.msk.f32.mxu0 %vm8715_vm0, %v8716_v5  ;;  %7698 = vmatprep.subr.mxu1 %v8716_v5 }
 0x1d7   :  { %7691 = vmatmul.mubr.msk.f32.vlgmr.msra.gmra.mrb[16].mxu1 %vm1211_vm6, %v7563_v40  ;;  %7693 = vmatprep.subr.mxu0 %v8716_v5 }
 0x1d8   :  { %7686 = vmatmul.mubr.msk.f32.vlgmr.msra.gmra.mrb[20].mxu0 %vm1211_vm6, %v527_v41  ;;  %7699 = vmatpush3.xpose.msk.msra.mxu1 %vm1211_vm6, %v7618_v34 }
 0x1d9   :  { %7694 = vmatpush3.xpose.msk.msra.mxu0 %vm1211_vm6, %v902_v35  ;;  %7700 = vmatprep.mubr.msk.f32.mxu1 %vm8715_vm0, %v8716_v5 }
 0x1da   :  { %7695 = vmatprep.mubr.msk.f32.mxu0 %vm8715_vm0, %v8716_v5  ;;  %7703 = vmatprep.subr.mxu0 %v8716_v5 }
 0x1db   :  { %7701 = vmatmul.mubr.msk.f32.vlgmr.msra.gmra.mrb[18].mxu1 %vm1211_vm6, %v7574_v31  ;;  %7708 = vmatprep.subr.mxu1 %v8716_v5  ;;  %v7629_v46 = vpop.f32.mrb[12].mxu0 }
 0x1dc   :  { %7696 = vmatmul.mubr.msk.f32.vlgmr.msra.gmra.mrb[22].mxu0 %vm1211_vm6, %v602_v32  ;;  %7710 = vmatprep.mubr.msk.f32.mxu1 %vm8715_vm0, %v8716_v5  ;;  %v977_v48 = vpop.f32.mrb[13].mxu0 }
 0x1dd   :  { %7705 = vmatprep.mubr.msk.f32.mxu0 %vm8715_vm0, %v8716_v5  ;;  %7709 = vmatpush3.msra.mxu1 %v7629_v46 }
 0x1de   :  { %7704 = vmatpush3.msra.mxu0 %v977_v48  ;;  %7718 = vmatprep.subr.mxu1 %v8716_v5 }
 0x1df   :  { %7713 = vmatprep.subr.mxu0 %v8716_v5 }
 0x1e3   :  { %v9027_v49 = vpop.f32.mrb[14].mxu0 }
 0x1e4   :  { %v9031_v51 = vpop.f32.mrb[15].mxu0 }
 0x2a2   :  { %v1360_v53 = vpop.f32.mrb[12].mxu1 }
 0x2a3   :  { %v1284_v54 = vpop.f32.mrb[16].mxu0  ;;  %v7672_v55 = vpop.f32.mrb[13].mxu1  ;;  %v1821_v58 = vmul.f32 0.35355338, %v1360_v53 }
 0x2a4   :  { %v1820_v56 = vmul.f32 0.35355338, %v1284_v54  ;;  %v7667_v57 = vpop.f32.mrb[17].mxu0 }
 0x2a5   :  { %v1831_v8 = vsel %vm1211_vm6, %v1821_v58, -inf }
 0x2a6   :  { %v1512_v59 = vpop.f32.mrb[14].mxu1  ;;  %v1828_v60 = vsel %vm1211_vm6, %v1820_v56, -inf }
 0x2a7   :  { %v7682_v61 = vpop.f32.mrb[15].mxu1  ;;  %1829 = vmax.xlane.f32.xlu0 %v1828_v60  ;;  %v1436_v62 = vpop.f32.mrb[18].mxu0  ;;  %v1823_v4 = vmul.f32 0.35355338, %v1512_v59 }
 0x2a8   :  { %v1822_v63 = vmul.f32 0.35355338, %v1436_v62  ;;  %v7677_v2 = vpop.f32.mrb[19].mxu0  ;;  %v9046_v61 = vsub.s32 0, %v8764_v6 }
 0x2a9   :  { %v1837_v17 = vsel %vm1211_vm6, %v1823_v4, -inf }
 0x2aa   :  { %v1664_v7 = vpop.f32.mrb[16].mxu1  ;;  %v1834_v9 = vsel %vm1211_vm6, %v1822_v63, -inf }
 0x2ab   :  { %v7692_v10 = vpop.f32.mrb[17].mxu1  ;;  %1832 = vmax.xlane.f32.xlu0 %v1831_v8  ;;  %1835 = vmax.xlane.f32.xlu1 %v1834_v9  ;;  %v1588_v11 = vpop.f32.mrb[20].mxu0  ;;  %v1825_v15 = vmul.f32 0.35355338, %v1664_v7 }
 0x2ac   :  { %v1824_v13 = vmul.f32 0.35355338, %v1588_v11  ;;  %v7687_v14 = vpop.f32.mrb[21].mxu0 }
 0x2ad   :  { %v1843_v24 = vsel %vm1211_vm6, %v1825_v15, -inf }
 0x2ae   :  { %v1816_v16 = vpop.f32.mrb[18].mxu1  ;;  %v1840_v18 = vsel %vm1211_vm6, %v1824_v13, -inf }
 0x2af   :  { %v7702_v19 = vpop.f32.mrb[19].mxu1  ;;  %1838 = vmax.xlane.f32.xlu1 %v1837_v17  ;;  %1841 = vmax.xlane.f32.xlu0 %v1840_v18  ;;  %v1740_v20 = vpop.f32.mrb[22].mxu0  ;;  %v1827_v23 = vmul.f32 0.35355338, %v1816_v16 }
 0x2b0   :  { %v1826_v21 = vmul.f32 0.35355338, %v1740_v20  ;;  %v7697_v22 = vpop.f32.mrb[23].mxu0 }
 0x2b1   :  { %v1849_v26 = vsel %vm1211_vm6, %v1827_v23, -inf }
 0x2b2   :  { %v1846_v25 = vsel %vm1211_vm6, %v1826_v21, -inf }
 0x2b3   :  { %1844 = vmax.xlane.f32.xlu1 %v1843_v24  ;;  %1847 = vmax.xlane.f32.xlu0 %v1846_v25 }
 0x2b7   :  { %1850 = vmax.xlane.f32.xlu1 %v1849_v26 }
 0x334   :  { %v1830_v27 = vpop.xlane.xlu0 %1829 }
 0x335   :  { %v1852_v28 = vsub.f32 %v1820_v56, %v1830_v27 }
 0x337   :  { %v1860_v29 = vmul.f32 1.442695, %v1852_v28 }
 0x338   :  { %v1833_v30 = vpop.xlane.xlu0 %1832  ;;  %v1836_v31 = vpop.xlane.xlu1 %1835 }
 0x339   :  { %8596 = vpow2.f32 %v1860_v29  ;;  %v1853_v32 = vsub.f32 %v1821_v58, %v1833_v30  ;;  %v1854_v0 = vsub.f32 %v1822_v63, %v1836_v31  ;;  %v9052_v63 = vld [vmem:[%s9937_s3] sm:$0xff] }
 0x33a   :  { %v111_v8 = vrot.slane %v9052_v63, %v9046_v61 }
 0x33b   :  { %v1862_v33 = vmul.f32 1.442695, %v1853_v32  ;;  %v1864_v34 = vmul.f32 1.442695, %v1854_v0 }
 0x33c   :  { %v1839_v35 = vpop.xlane.xlu1 %1838  ;;  %v1842_v37 = vpop.xlane.xlu0 %1841  ;;  %v186_v14 = vadd.f32 %v8979_v36, %v111_v8  ;;  %v295_v8 = vld [vmem:[%s9935_s1 + $0x1b0] sm:$0xff] }
 0x33d   :  { %8598 = vpow2.f32 %v1862_v33  ;;  %v1855_v38 = vsub.f32 %v1823_v4, %v1839_v35  ;;  %v1856_v39 = vsub.f32 %v1824_v13, %v1842_v37 }
 0x33e   :  { %8600 = vpow2.f32 %v1864_v34  ;;  %v190_v18 = vsel %vm189_vm7, %v186_v14, -inf }
 0x33f   :  { %v1866_v40 = vmul.f32 1.442695, %v1855_v38  ;;  %v1868_v41 = vmul.f32 1.442695, %v1856_v39 }
 0x340   :  { %v1845_v42 = vpop.xlane.xlu1 %1844  ;;  %v1848_v1 = vpop.xlane.xlu0 %1847 }
 0x341   :  { %8602 = vpow2.f32 %v1866_v40  ;;  %v1857_v43 = vsub.f32 %v1825_v15, %v1845_v42  ;;  %v1858_v44 = vsub.f32 %v1826_v21, %v1848_v1  ;;  %v8718_v42 = vmov 0   ;;  %v289_v1 = vld [vmem:[%s9935_s1 + $0x180] sm:$0xff] }
 0x342   :  { %8604 = vpow2.f32 %v1868_v41  ;;  %8587 = vset.pattern.permute.xlu0 %v8718_v42 }
 0x343   :  { %v8597_v46 = vpop.eup %8596  ;;  %v1870_v48 = vmul.f32 1.442695, %v1857_v43  ;;  %v1872_v53 = vmul.f32 1.442695, %v1858_v44  ;;  %v290_v43 = vld [vmem:[%s9935_s1 + $0x188] sm:$0xff] }
 0x344   :  { %v1851_v54 = vpop.xlane.xlu1 %1850  ;;  %v1876_v55 = vsel %vm1211_vm6, %v8597_v46, 0.0 }
 0x345   :  { %8606 = vpow2.f32 %v1870_v48  ;;  %v1859_v56 = vsub.f32 %v1827_v23, %v1851_v54  ;;  %1877 = vadd.xlane.f32.xlu0 %v1876_v55  ;;  %v291_v48 = vld [vmem:[%s9935_s1 + $0x190] sm:$0xff] }
 0x346   :  { %8608 = vpow2.f32 %v1872_v53  ;;  %v292_v53 = vld [vmem:[%s9935_s1 + $0x198] sm:$0xff] }
 0x347   :  { %v8599_v57 = vpop.eup %8598  ;;  %v1874_v58 = vmul.f32 1.442695, %v1859_v56  ;;  %v8307_v54 = vpack.c.bf16 %v292_v53, %v291_v48 }
 0x348   :  { %v8601_v59 = vpop.eup %8600  ;;  %v1879_v60 = vsel %vm1211_vm6, %v8599_v57, 0.0 }
 0x349   :  { %8610 = vpow2.f32 %v1874_v58  ;;  %1880 = vadd.xlane.f32.xlu1 %v1879_v60  ;;  %v1882_v62 = vsel %vm1211_vm6, %v8601_v59, 0.0  ;;  %v8719_v58 = vmov 2   ;;  %v293_v60 = vld [vmem:[%s9935_s1 + $0x1a0] sm:$0xff] }
 0x34a   :  { %1883 = vadd.xlane.f32.xlu0 %v1882_v62  ;;  %v294_v62 = vld [vmem:[%s9935_s1 + $0x1a8] sm:$0xff] }
 0x34b   :  { %v8603_v2 = vpop.eup %8602 }
 0x34c   :  { %v8605_v4 = vpop.eup %8604  ;;  %v1885_v7 = vsel %vm1211_vm6, %v8603_v2, 0.0 }
 0x34d   :  { %1886 = vadd.xlane.f32.xlu1 %v1885_v7  ;;  %v1888_v9 = vsel %vm1211_vm6, %v8605_v4, 0.0 }
 0x34e   :  { %1889 = vadd.xlane.f32.xlu0 %v1888_v9  ;;  %v296_v9 = vld [vmem:[%s9935_s1 + $0x1b8] sm:$0xff] }
 0x34f   :  { %v8607_v10 = vpop.eup %8606 }
 0x350   :  { %v8609_v11 = vpop.eup %8608  ;;  %v1891_v13 = vsel %vm1211_vm6, %v8607_v10, 0.0 }
 0x351   :  { %1892 = vadd.xlane.f32.xlu1 %v1891_v13  ;;  %v1894_v15 = vsel %vm1211_vm6, %v8609_v11, 0.0 }
 0x352   :  { %1895 = vadd.xlane.f32.xlu0 %v1894_v15  ;;  %v8323_v15 = vpack.c.bf16 %v296_v9, %v295_v8 }
 0x353   :  { %v9061_v16 = vpop.eup %8610 }
 0x354   :  { %v1897_v17 = vsel %vm1211_vm6, %v9061_v16, 0.0 }
 0x355   :  { %1898 = vadd.xlane.f32.xlu1 %v1897_v17 }
 0x356   :  { %191 = vmax.xlane.f32.xlu0 %v190_v18 }
 0x3d2   :  { %v1878_v19 = vpop.xlane.xlu0 %1877 }
 0x3d3   :  { %8612 = vrcp.f32 %v1878_v19 }
 0x3d6   :  { %v1881_v20 = vpop.xlane.xlu1 %1880 }
 0x3d7   :  { %8614 = vrcp.f32 %v1881_v20  ;;  %v1884_v21 = vpop.xlane.xlu0 %1883  ;;  %v297_v20 = vld [vmem:[%s9935_s1 + $0x1c0] sm:$0xff] }
 0x3d8   :  { %8616 = vrcp.f32 %v1884_v21  ;;  %v298_v21 = vld [vmem:[%s9935_s1 + $0x1c8] sm:$0xff] }
 0x3da   :  { %v1887_v36 = vpop.xlane.xlu1 %1886 }
 0x3db   :  { %8618 = vrcp.f32 %v1887_v36  ;;  %v1890_v22 = vpop.xlane.xlu0 %1889 }
 0x3dc   :  { %8620 = vrcp.f32 %v1890_v22 }
 0x3dd   :  { %v8613_v23 = vpop.eup %8612 }
 0x3de   :  { %v1908_v24 = vmul.f32 %v8613_v23, %v8597_v46  ;;  %v1893_v25 = vpop.xlane.xlu1 %1892  ;;  %v8303_v46 = vpack.c.bf16 %v290_v43, %v289_v1 }
 0x3df   :  { %8622 = vrcp.f32 %v1893_v25  ;;  %v1896_v26 = vpop.xlane.xlu0 %1895  ;;  %v8335_v25 = vpack.c.bf16 %v298_v21, %v297_v20 }
 0x3e0   :  { %8624 = vrcp.f32 %v1896_v26  ;;  %7706 = vmatmul.mubr.msk.f32.vlgmr.msra.gmra.mrb[24].mxu0 %vm1211_vm6, %v1908_v24 }
 0x3e1   :  { %v8615_v27 = vpop.eup %8614  ;;  %7714 = vmatpush3.msra.mxu0 %v9023_v47  ;;  %7715 = vmatprep.mubr.msk.f32.mxu0 %vm8715_vm0, %v8716_v5 }
 0x3e2   :  { %v8617_v28 = vpop.eup %8616  ;;  %v1909_v29 = vmul.f32 %v8615_v27, %v8599_v57  ;;  %v1899_v30 = vpop.xlane.xlu1 %1898  ;;  %7723 = vmatprep.subr.mxu0 %v8716_v5 }
 0x3e3   :  { %v1910_v31 = vmul.f32 %v8617_v28, %v8601_v59  ;;  %8626 = vrcp.f32 %v1899_v30  ;;  %v192_v32 = vpop.xlane.xlu0 %191  ;;  %v8720_v59 = vmov 3   ;;  %v299_v28 = vld [vmem:[%s9935_s1 + $0x1d0] sm:$0xff] }
 0x3e4   :  { %v193_v0 = vsub.f32 %v186_v14, %v192_v32  ;;  %7711 = vmatmul.mubr.msk.f32.vlgmr.msra.gmra.mrb[20].mxu1 %vm1211_vm6, %v1909_v29  ;;  %v300_v29 = vld [vmem:[%s9935_s1 + $0x1d8] sm:$0xff]  ;;  %v302_v32 = vld [vmem:[%s9935_s1 + $0x1e8] sm:$0xff] }
 0x3e5   :  { %v8619_v33 = vpop.eup %8618  ;;  %7716 = vmatmul.mubr.msk.f32.vlgmr.msra.gmra.mrb[26].mxu0 %vm1211_vm6, %v1910_v31  ;;  %7719 = vmatpush3.msra.mxu1 %v9021_v45  ;;  %v8339_v30 = vpack.c.bf16 %v300_v29, %v299_v28  ;;  %v301_v31 = vld [vmem:[%s9935_s1 + $0x1e0] sm:$0xff] }
 0x3e6   :  { %v8621_v47 = vpop.eup %8620  ;;  %v1911_v34 = vmul.f32 %v8619_v33, %v8603_v2  ;;  %v194_v35 = vmul.f32 1.442695, %v193_v0  ;;  %7724 = vmatpush3.msra.mxu0 %v9031_v51  ;;  %7720 = vmatprep.mubr.msk.f32.mxu1 %vm8715_vm0, %v8716_v5  ;;  %v8319_v2 = vpack.c.bf16 %v294_v62, %v293_v60  ;;  %v8351_v0 = vpack.c.bf16 %v302_v32, %v301_v31  ;;  %v303_v33 = vld [vmem:[%s9935_s1 + $0x1f0] sm:$0xff] }
 0x3e7   :  { %v1912_v37 = vmul.f32 %v8621_v47, %v8605_v4  ;;  %7725 = vmatprep.mubr.msk.f32.mxu0 %vm8715_vm0, %v8716_v5  ;;  %7728 = vmatprep.subr.mxu1 %v8716_v5  ;;  %v304_v47 = vld [vmem:[%s9935_s1 + $0x1f8] sm:$0xff] }
 0x3e8   :  { %8628 = vpow2.f32 %v194_v35  ;;  %7733 = vmatprep.subr.mxu0 %v8716_v5  ;;  %7721 = vmatmul.mubr.msk.f32.vlgmr.msra.gmra.mrb[22].mxu1 %vm1211_vm6, %v1911_v34  ;;  %v8355_v34 = vpack.c.bf16 %v304_v47, %v303_v33 }
 0x3e9   :  { %v8623_v45 = vpop.eup %8622  ;;  %7726 = vmatmul.mubr.msk.f32.vlgmr.msra.gmra.mrb[28].mxu0 %vm1211_vm6, %v1912_v37  ;;  %7729 = vmatpush3.msra.mxu1 %v9027_v49 }
 0x3ea   :  { %v8625_v51 = vpop.eup %8624  ;;  %v1913_v38 = vmul.f32 %v8623_v45, %v8607_v10  ;;  %7734 = vmatpush3.msra.mxu0 %v9033_v52  ;;  %7730 = vmatprep.mubr.msk.f32.mxu1 %vm8715_vm0, %v8716_v5 }
 0x3eb   :  { %v1914_v39 = vmul.f32 %v8625_v51, %v8609_v11  ;;  %7735 = vmatprep.mubr.msk.f32.mxu0 %vm8715_vm0, %v8716_v5  ;;  %7738 = vmatprep.subr.mxu1 %v8716_v5 }
 0x3ec   :  { %7731 = vmatmul.mubr.msk.f32.vlgmr.msra.gmra.mrb[24].mxu1 %vm1211_vm6, %v1913_v38  ;;  %8302 = vmatprep.subr.bf16.mxu0 %v8714_v3 }
 0x3ed   :  { %v8627_v40 = vpop.eup %8626  ;;  %7736 = vmatmul.mubr.msk.f32.vlgmr.msra.gmra.mrb[30].mxu0 %vm1211_vm6, %v1914_v39  ;;  %7739 = vmatpush3.msra.mxu1 %v9029_v50  ;;  %v8717_v50 = vmov 1  }
 0x3ee   :  { %v1915_v49 = vmul.f32 %v8627_v40, %v9061_v16  ;;  %7740 = vmatprep.mubr.msk.f32.mxu1 %vm8715_vm0, %v8716_v5  ;;  %8310 = vmatprep.subr.bf16.mxu1 %v8714_v3 }
 0x3ef   :  { %7751 = vmatprep.mubr.msk.f32.mxu0 %vm8715_vm0, %v8716_v5  ;;  %8588 = vset.pattern.permute.xlu1 %v8717_v50 }
 0x3f0   :  { %7741 = vmatmul.mubr.msk.f32.vlgmr.msra.gmra.mrb[26].mxu1 %vm1211_vm6, %v1915_v49 }
 0x3f1   :  { %7762 = vmatprep.mubr.msk.f32.mxu1 %vm8715_vm0, %v8716_v5  ;;  %8305 = vmatpush3.bf16.xpose.msk.msra.mxu0 %vm9112_vm8, %v8303_v46 }
 0x3f2   :  { %v8629_v52 = vpop.eup %8628  ;;  %8306 = vmatprep.subr.bf16.mxu0 %v8714_v3 }
 0x3f3   :  { %v196_v41 = vsel %vm189_vm7, %v8629_v52, 0.0 }
 0x3f4   :  { %197 = vadd.xlane.f32.xlu1 %v196_v41  ;;  %8313 = vmatpush3.bf16.xpose.msk.msra.mxu1 %vm9112_vm8, %v8303_v46 }
 0x3f5   :  { %8314 = vmatprep.subr.bf16.mxu1 %v8714_v3 }
 0x3f9   :  { %8309 = vmatpush3.bf16.xpose.msk.msra.mxu0 %vm9112_vm8, %v8307_v54 }
 0x3fa   :  { %8318 = vmatprep.subr.bf16.mxu0 %v8714_v3 }
 0x3fc   :  { %8317 = vmatpush3.bf16.xpose.msk.msra.mxu1 %vm9112_vm8, %v8307_v54 }
 0x3fd   :  { %8326 = vmatprep.subr.bf16.mxu1 %v8714_v3 }
 0x481   :  { %v198_v55 = vpop.xlane.xlu1 %197 }
 0x482   :  { %8630 = vrcp.f32 %v198_v55 }
 0x48c   :  { %v8631_v56 = vpop.eup %8630 }
 0x48d   :  { %v9134_v57 = vmul.f32 %v8631_v56, %v8629_v52 }
 0x48f   :  { %211 = vperm.xlu1 %8588, %v9134_v57   ;;  %203 = vperm.xlu0 %8587, %v9134_v57  }
 0x493   :  { %8589 = vset.pattern.permute.xlu1 %v8719_v58  ;;  %8592 = vset.pattern.permute.xlu0 %v8717_v50 }
 0x494   :  { %219 = vperm.xlu1 %8589, %v9134_v57  }
 0x498   :  { %8590 = vset.pattern.permute.xlu1 %v8720_v59 }
 0x499   :  { %227 = vperm.xlu1 %8590, %v9134_v57  }
 0x49d   :  { %8591 = vset.pattern.permute.xlu1 %v8718_v42 }
 0x4b3   :  { %v1985_v4 = vpop.f32.mrb[24].mxu0 }
 0x4b4   :  { %v7707_v7 = vpop.f32.mrb[25].mxu0  ;;  %7752 = vmatmul.mubr.msk.f32.vlgmr.msra.gmra.mrb[32].mxu0 %vm1211_vm6, %v1985_v4 }
 0x4b5   :  { %8321 = vmatpush3.bf16.xpose.msk.msra.mxu0 %vm9112_vm8, %v8319_v2  ;;  %7773 = vmatprep.mubr.msk.f32.mxu0 %vm8715_vm0, %v8716_v5 }
 0x4b6   :  { %8322 = vmatprep.subr.bf16.mxu0 %v8714_v3 }
 0x4b7   :  { %v2058_v10 = vpop.f32.mrb[20].mxu1 }
 0x4b8   :  { %v2131_v11 = vpop.f32.mrb[26].mxu0  ;;  %v7712_v13 = vpop.f32.mrb[21].mxu1  ;;  %7763 = vmatmul.mubr.msk.f32.vlgmr.msra.gmra.mrb[28].mxu1 %vm1211_vm6, %v2058_v10 }
 0x4b9   :  { %v7717_v14 = vpop.f32.mrb[27].mxu0  ;;  %8329 = vmatpush3.bf16.xpose.msk.msra.mxu1 %vm9112_vm8, %v8319_v2  ;;  %7784 = vmatprep.mubr.msk.f32.mxu1 %vm8715_vm0, %v8716_v5 }
 0x4ba   :  { %8330 = vmatprep.subr.bf16.mxu1 %v8714_v3 }
 0x4bb   :  { %v2204_v16 = vpop.f32.mrb[22].mxu1 }
 0x4bc   :  { %v2277_v17 = vpop.f32.mrb[28].mxu0  ;;  %v7722_v18 = vpop.f32.mrb[23].mxu1 }
 0x4bd   :  { %v7727_v19 = vpop.f32.mrb[29].mxu0  ;;  %8325 = vmatpush3.bf16.xpose.msk.msra.mxu0 %vm9112_vm8, %v8323_v15  ;;  %v9248_v18 = vsub.s32 2, %v8764_v6 }
 0x4be   :  { %8334 = vmatprep.subr.bf16.mxu0 %v8714_v3  ;;  %v9251_v19 = vsub.s32 3, %v8764_v6 }
 0x4bf   :  { %v2350_v36 = vpop.f32.mrb[24].mxu1 }
 0x4c0   :  { %v2423_v22 = vpop.f32.mrb[30].mxu0  ;;  %v7732_v23 = vpop.f32.mrb[25].mxu1 }
 0x4c1   :  { %v7737_v24 = vpop.f32.mrb[31].mxu0  ;;  %8333 = vmatpush3.bf16.xpose.msk.msra.mxu1 %vm9112_vm8, %v8323_v15  ;;  %v9244_v15 = vsub.s32 1, %v8764_v6 }
 0x4c2   :  { %8342 = vmatprep.subr.bf16.mxu1 %v8714_v3 }
 0x4c3   :  { %v2496_v26 = vpop.f32.mrb[26].mxu1 }
 0x4c4   :  { %7774 = vmatmul.mubr.msk.f32.vlgmr.msra.gmra.mrb[34].mxu0 %vm1211_vm6, %v2131_v11  ;;  %v7742_v27 = vpop.f32.mrb[27].mxu1 }
 0x4c5   :  { %8337 = vmatpush3.bf16.xpose.msk.msra.mxu0 %vm9112_vm8, %v8335_v25  ;;  %7795 = vmatprep.mubr.msk.f32.mxu0 %vm8715_vm0, %v8716_v5 }
 0x4c6   :  { %8338 = vmatprep.subr.bf16.mxu0 %v8714_v3 }
 0x4c8   :  { %7785 = vmatmul.mubr.msk.f32.vlgmr.msra.gmra.mrb[30].mxu1 %vm1211_vm6, %v2204_v16 }
 0x4c9   :  { %8345 = vmatpush3.bf16.xpose.msk.msra.mxu1 %vm9112_vm8, %v8335_v25  ;;  %7806 = vmatprep.mubr.msk.f32.mxu1 %vm8715_vm0, %v8716_v5 }
 0x4ca   :  { %8346 = vmatprep.subr.bf16.mxu1 %v8714_v3 }
 0x4cd   :  { %8341 = vmatpush3.bf16.xpose.msk.msra.mxu0 %vm9112_vm8, %v8339_v30 }
 0x4ce   :  { %8350 = vmatprep.subr.bf16.mxu0 %v8714_v3 }
 0x4d1   :  { %8349 = vmatpush3.bf16.xpose.msk.msra.mxu1 %vm9112_vm8, %v8339_v30 }
 0x4d2   :  { %8358 = vmatprep.subr.bf16.mxu1 %v8714_v3 }
 0x4d4   :  { %7796 = vmatmul.mubr.msk.f32.vlgmr.msra.gmra.mrb[36].mxu0 %vm1211_vm6, %v2277_v17 }
 0x4d5   :  { %8353 = vmatpush3.bf16.xpose.msk.msra.mxu0 %vm9112_vm8, %v8351_v0  ;;  %7817 = vmatprep.mubr.msk.f32.mxu0 %vm8715_vm0, %v8716_v5 }
 0x4d6   :  { %8354 = vmatprep.subr.bf16.mxu0 %v8714_v3 }
 0x4d8   :  { %7807 = vmatmul.mubr.msk.f32.vlgmr.msra.gmra.mrb[32].mxu1 %vm1211_vm6, %v2350_v36 }
 0x4d9   :  { %8361 = vmatpush3.bf16.xpose.msk.msra.mxu1 %vm9112_vm8, %v8351_v0  ;;  %7828 = vmatprep.mubr.msk.f32.mxu1 %vm8715_vm0, %v8716_v5 }
 0x4da   :  { %8362 = vmatprep.subr.bf16.mxu1 %v8714_v3 }
 0x4dd   :  { %8357 = vmatpush3.bf16.xpose.msk.msra.mxu0 %vm9112_vm8, %v8355_v34 }
 0x4e1   :  { %8365 = vmatpush3.bf16.xpose.msk.msra.mxu1 %vm9112_vm8, %v8355_v34 }
 0x4e4   :  { %7818 = vmatmul.mubr.msk.f32.vlgmr.msra.gmra.mrb[38].mxu0 %vm1211_vm6, %v2423_v22 }
 0x4e8   :  { %7829 = vmatmul.mubr.msk.f32.vlgmr.msra.gmra.mrb[34].mxu1 %vm1211_vm6, %v2496_v26 }
 0x50e   :  { %v212_v35 = vpop.permute.xlu1 %211  ;;  %v204_v37 = vpop.permute.xlu0 %203 }
 0x50f   :  { %vm214_vm9 = vcmp.gt.f32.partialorder %v212_v35, %v9134_v57  ;;  %vm206_vm10 = vcmp.gt.f32.partialorder %v204_v37, %v9134_v57 }
 0x510   :  { %v6917_v51 = vsel %vm214_vm9, 1.0, %v8716_v5  ;;  %v6916_v38 = vsel %vm206_vm10, 1.0, %v8716_v5 }
 0x511   :  { %v217_v40 = vadd.f32 %v6917_v51, %v6916_v38 }
 0x513   :  { %v220_v45 = vpop.permute.xlu1 %219 }
 0x514   :  { %vm222_vm11 = vcmp.gt.f32.partialorder %v220_v45, %v9134_v57 }
 0x515   :  { %v6918_v39 = vsel %vm222_vm11, 1.0, %v8716_v5 }
 0x516   :  { %v225_v52 = vadd.f32 %v6918_v39, %v217_v40 }
 0x518   :  { %v228_v49 = vpop.permute.xlu1 %227 }
 0x519   :  { %vm230_vm12 = vcmp.gt.f32.partialorder %v228_v49, %v9134_v57 }
 0x51a   :  { %v6919_v41 = vsel %vm230_vm12, 1.0, %v8716_v5 }
 0x51b   :  { %v233_v50 = vadd.f32 %v6919_v41, %v225_v52 }
 0x51d   :  { %vm234_vm13 = vcmp.lt.f32.partialorder %v233_v50, 2.0 }
 0x51e   :  { %v235_v42 = vsel %vm234_vm13, %v9134_v57, 0.0 }
 0x51f   :  { %v236_v1 = vsel %vm189_vm7, %v235_v42, 0.0 }
 0x520   :  { %237 = vadd.xlane.f32.xlu1 %v236_v1  ;;  %v8688_v1 = vld [vmem:[%s9934_s0] sm:$0xff] }
 0x587   :  { %v2581_v43 = vpop.f32.mrb[32].mxu0 }
 0x588   :  { %v7753_v46 = vpop.f32.mrb[33].mxu0 }
 0x58b   :  { %v2654_v48 = vpop.f32.mrb[28].mxu1 }
 0x58c   :  { %v7764_v53 = vpop.f32.mrb[29].mxu1 }
 0x597   :  { %v2739_v54 = vpop.f32.mrb[34].mxu0 }
 0x598   :  { %v7775_v55 = vpop.f32.mrb[35].mxu0 }
 0x59b   :  { %v2812_v56 = vpop.f32.mrb[30].mxu1 }
 0x59c   :  { %v7786_v60 = vpop.f32.mrb[31].mxu1 }
 0x5a7   :  { %v2897_v62 = vpop.f32.mrb[36].mxu0 }
 0x5a8   :  { %v7797_v2 = vpop.f32.mrb[37].mxu0 }
 0x5ab   :  { %v2970_v4 = vpop.f32.mrb[32].mxu1 }
 0x5ac   :  { %v7808_v7 = vpop.f32.mrb[33].mxu1 }
 0x5ad   :  { %v238_v8 = vpop.xlane.xlu1 %237 }
 0x5ae   :  { %8632 = vrcp.f32 %v238_v8 }
 0x5b7   :  { %v3055_v9 = vpop.f32.mrb[38].mxu0 }
 0x5b8   :  { %v8633_v10 = vpop.eup %8632  ;;  %v7819_v57 = vpop.f32.mrb[39].mxu0 }
 0x5b9   :  { %v240_v11 = vmul.f32 %v8633_v10, %v235_v42 }
 0x5bb   :  { %v3128_v13 = vpop.f32.mrb[34].mxu1  ;;  %v3135_v14 = vrot.slane %v240_v11, %v9046_v61  ;;  %v3142_v17 = vrot.slane %v240_v11, %v9244_v15 }
 0x5bc   :  { %v7830_v16 = vpop.f32.mrb[35].mxu1 }
 0x5bd   :  { %3137 = vbcast.lane.b32.xlu0 %v3135_v14, 256  ;;  %v3242_v14 = vld [vmem:[%s9936_s2 + $0x8] sm:$0xff] }
 0x5c1   :  { %3144 = vbcast.lane.b32.xlu0 %v3142_v17, 256  ;;  %v3243_v17 = vld [vmem:[%s9936_s2 + $0x10] sm:$0xff] }
 0x62f   :  { %v3138_v20 = vpop.permute.xlu0 %3137 }
 0x630   :  { %v3149_v21 = vrot.slane %v3138_v20, %v9046_v61  ;;  %v3153_v36 = vrot.slane %v3138_v20, %v9244_v15  ;;  %v3157_v22 = vrot.slane %v3138_v20, %v9248_v18  ;;  %v3161_v23 = vrot.slane %v3138_v20, %v9251_v19  ;;  %v3244_v20 = vld [vmem:[%s9936_s2 + $0x18] sm:$0xff] }
 0x632   :  { %v3178_v24 = vmul.f32 %v3149_v21, %v2581_v43  ;;  %v3179_v25 = vmul.f32 %v3153_v36, %v2739_v54  ;;  %v3180_v26 = vmul.f32 %v3157_v22, %v2897_v62  ;;  %v3181_v32 = vmul.f32 %v3161_v23, %v3055_v9  ;;  %v8689_v54 = vld [vmem:[%s9934_s0 + $0x8] sm:$0xff]  ;;  %v3245_v36 = vld [vmem:[%s9936_s2 + $0x20] sm:$0xff]  ;;  %v3247_v23 = vld [vmem:[%s9936_s2 + $0x30] sm:$0xff] }
 0x633   :  { %v3145_v27 = vpop.permute.xlu0 %3144  ;;  %v8370_v21 = vpack.c.bf16 %v3244_v20, %v3243_v17  ;;  %v3246_v22 = vld [vmem:[%s9936_s2 + $0x28] sm:$0xff] }
 0x634   :  { %v3165_v28 = vrot.slane %v3145_v27, %v9046_v61  ;;  %v3169_v29 = vrot.slane %v3145_v27, %v9244_v15  ;;  %v3173_v30 = vrot.slane %v3145_v27, %v9248_v18  ;;  %v3177_v31 = vrot.slane %v3145_v27, %v9251_v19  ;;  %v3249_v27 = vld [vmem:[%s9936_s2 + $0x40] sm:$0xff] }
 0x635   :  { %v3186_v0 = vsel %vm112_vm1, %v3178_v24, 0.0  ;;  %v3187_v33 = vsel %vm112_vm1, %v3179_v25, 0.0  ;;  %v3189_v45 = vsel %vm112_vm1, %v3180_v26, 0.0  ;;  %v3191_v49 = vsel %vm112_vm1, %v3181_v32, 0.0  ;;  %v3248_v25 = vld [vmem:[%s9936_s2 + $0x38] sm:$0xff] }
 0x636   :  { %v3182_v47 = vmul.f32 %v3165_v28, %v2654_v48  ;;  %v3183_v34 = vmul.f32 %v3169_v29, %v2812_v56  ;;  %v3184_v35 = vmul.f32 %v3173_v30, %v2970_v4  ;;  %v3188_v37 = vadd.f32 %v3187_v33, %v3186_v0  ;;  %v3250_v28 = vld [vmem:[%s9936_s2 + $0x48] sm:$0xff] }
 0x637   :  { %v3185_v38 = vmul.f32 %v3177_v31, %v3128_v13  ;;  %v3241_v13 = vld [vmem:[%s9936_s2] sm:$0xff]  ;;  %v8374_v24 = vpack.c.bf16 %v3246_v22, %v3245_v36  ;;  %v8378_v26 = vpack.c.bf16 %v3248_v25, %v3247_v23  ;;  %v8382_v29 = vpack.c.bf16 %v3250_v28, %v3249_v27  ;;  %v7026_v25 = vld [vmem:[%s9935_s1 + $0x228] sm:$0xff]  ;;  %v7027_v27 = vld [vmem:[%s9935_s1 + $0x230] sm:$0xff] }
 0x638   :  { %v3190_v51 = vadd.f32 %v3189_v45, %v3188_v37  ;;  %v3193_v39 = vsel %vm112_vm1, %v3182_v47, 0.0  ;;  %v3194_v40 = vsel %vm112_vm1, %v3183_v34, 0.0  ;;  %v3196_v50 = vsel %vm112_vm1, %v3184_v35, 0.0  ;;  %v7028_v28 = vld [vmem:[%s9935_s1 + $0x238] sm:$0xff] }
 0x639   :  { %v3195_v52 = vadd.f32 %v3194_v40, %v3193_v39  ;;  %v3198_v46 = vsel %vm112_vm1, %v3185_v38, 0.0  ;;  %v8366_v16 = vpack.c.bf16 %v3242_v14, %v3241_v13  ;;  %8375 = vmatprep.subr.bf16.mxu1 %v8374_v24  ;;  %v3237_v34 = vsub.s32 4, %v8764_v6 }
 0x63a   :  { %v3192_v41 = vadd.f32 %v3191_v49, %v3190_v51  ;;  %8377 = vmatpush3.bf16.msra.mxu1 %v8374_v24  ;;  %v3232_v35 = vrot.slane %v9052_v63, %v9251_v19  ;;  %v7025_v24 = vld [vmem:[%s9935_s1 + $0x220] sm:$0xff] }
 0x63b   :  { %v3197_v42 = vadd.f32 %v3196_v50, %v3195_v52  ;;  %8367 = vmatprep.subr.bf16.mxu0 %v8366_v16  ;;  %8379 = vmatprep.subr.bf16.mxu1 %v8378_v26  ;;  %v3238_v51 = vrot.slane %v9052_v63, %v3237_v34  ;;  %v3251_v50 = vld [vmem:[%s9936_s2 + $0x50] sm:$0xff] }
 0x63c   :  { %v3200_v43 = vadd.f32 %v8688_v1, %v3192_v41  ;;  %8369 = vmatpush3.bf16.msra.mxu0 %v8366_v16 }
 0x63d   :  { %v3199_v48 = vadd.f32 %v3198_v46, %v3197_v42  ;;  %8371 = vmatprep.subr.bf16.mxu0 %v8370_v21  ;;  %v3252_v42 = vld [vmem:[%s9936_s2 + $0x58] sm:$0xff] }
 0x63e   :  { %v3202_v53 = vsel %vm112_vm1, %v3200_v43, 0.0  ;;  %8381 = vmatpush3.bf16.msra.mxu1 %v8378_v26  ;;  %v8386_v1 = vpack.c.bf16 %v3252_v42, %v3251_v50  ;;  %v8401_v26 = vpack.c.bf16 %v7026_v25, %v7025_v24  ;;  %v7068_v24 = vld [vmem:[%s9935_s1 + $0x378] sm:$0xff] }
 0x63f   :  { %3203 = vadd.xlane.f32.xlu0 %v3202_v53  ;;  %v3201_v55 = vadd.f32 %v8689_v54, %v3199_v48  ;;  %8383 = vmatprep.subr.bf16.mxu1 %v8382_v29 }
 0x640   :  { %8373 = vmatpush3.bf16.msra.mxu0 %v8370_v21 }
 0x641   :  { %v3205_v56 = vsel %vm112_vm1, %v3201_v55, 0.0  ;;  %8390 = vmatprep.subr.bf16.mxu0 %v8714_v3 }
 0x642   :  { %3206 = vadd.xlane.f32.xlu1 %v3205_v56  ;;  %8385 = vmatpush3.bf16.msra.mxu1 %v8382_v29  ;;  %v8405_v29 = vpack.c.bf16 %v7028_v28, %v7027_v27  ;;  %v7021_v27 = vld [vmem:[%s9935_s1 + $0x200] sm:$0xff]  ;;  %v7022_v28 = vld [vmem:[%s9935_s1 + $0x208] sm:$0xff] }
 0x643   :  { %8387 = vmatprep.subr.bf16.mxu1 %v8386_v1 }
 0x646   :  { %8389 = vmatpush3.bf16.msra.mxu1 %v8386_v1 }
 0x647   :  { %8402 = vmatprep.subr.bf16.mxu1 %v8401_v26 }
 0x6cc   :  { %v3204_v60 = vpop.xlane.xlu0 %3203 }
 0x6cd   :  { %v3209_v62 = vmul.f32 0.03125, %v3204_v60  ;;  %v3343_v60 = vrot.slane %v9052_v63, %v9248_v18 }
 0x6cf   :  { %v3211_v2 = vsub.f32 %v3200_v43, %v3209_v62  ;;  %v3207_v4 = vpop.xlane.xlu1 %3206  ;;  %v3256_v43 = vrot.slane %v9052_v63, %v9244_v15 }
 0x6d0   :  { %v3210_v7 = vmul.f32 0.03125, %v3207_v4 }
 0x6d1   :  { %v3213_v8 = vmul.f32 %v3211_v2, %v3211_v2 }
 0x6d2   :  { %v3212_v9 = vsub.f32 %v3201_v55, %v3210_v7 }
 0x6d3   :  { %v3215_v10 = vsel %vm112_vm1, %v3213_v8, 0.0 }
 0x6d4   :  { %3216 = vadd.xlane.f32.xlu1 %v3215_v10  ;;  %v3214_v57 = vmul.f32 %v3212_v9, %v3212_v9 }
 0x6d6   :  { %v3218_v11 = vsel %vm112_vm1, %v3214_v57, 0.0 }
 0x6d8   :  { %3219 = vadd.xlane.f32.xlu1 %v3218_v11 }
 0x761   :  { %v3217_v30 = vpop.xlane.xlu1 %3216 }
 0x762   :  { %v3221_v31 = vmul.f32 0.03125, %v3217_v30  ;;  %v7033_v30 = vld [vmem:[%s9935_s1 + $0x260] sm:$0xff] }
 0x764   :  { %v3223_v32 = vadd.f32 1e-05, %v3221_v31  ;;  %v7034_v31 = vld [vmem:[%s9935_s1 + $0x268] sm:$0xff] }
 0x765   :  { %v3220_v0 = vpop.xlane.xlu1 %3219 }
 0x766   :  { %8634 = vrsqrt.f32 %v3223_v32  ;;  %v3222_v33 = vmul.f32 0.03125, %v3220_v0  ;;  %v8417_v32 = vpack.c.bf16 %v7034_v31, %v7033_v30 }
 0x768   :  { %v3224_v47 = vadd.f32 1e-05, %v3222_v33 }
 0x76a   :  { %8636 = vrsqrt.f32 %v3224_v47 }
 0x770   :  { %v8635_v37 = vpop.eup %8634 }
 0x771   :  { %v3227_v45 = vmul.f32 %v8635_v37, %v3211_v2 }
 0x773   :  { %v3233_v38 = vmul.f32 %v3232_v35, %v3227_v45 }
 0x774   :  { %v8637_v39 = vpop.eup %8636 }
 0x775   :  { %v3228_v40 = vmul.f32 %v8637_v39, %v3212_v9  ;;  %v3239_v49 = vadd.f32 %v3238_v51, %v3233_v38  ;;  %v3462_v38 = vsub.s32 6, %v8764_v6 }
 0x777   :  { %v3234_v52 = vmul.f32 %v3232_v35, %v3228_v40  ;;  %7839 = vmatprep.mubr.msk.f32.mxu0 %vm112_vm1, %v3239_v49 }
 0x779   :  { %v3240_v41 = vadd.f32 %v3238_v51, %v3234_v52  ;;  %v3456_v51 = vsub.s32 5, %v8764_v6 }
 0x77b   :  { %7840 = vmatmul.mubr.msk.f32.vlgmr.msra.gmra.mrb[40].mxu0 %vm112_vm1, %v3240_v41  ;;  %v3457_v39 = vrot.slane %v9052_v63, %v3456_v51 }
 0x77c   :  { %7865 = vmatprep.mubr.msk.f32.mxu0 %vm8715_vm0, %v8716_v5 }
 0x84e   :  { %v7841_v46 = vpop.f32.mrb[40].mxu0 }
 0x84f   :  { %v3335_v48 = vadd.f32 %v7841_v46, %v3256_v43  ;;  %v3329_v53 = vpop.f32.mrb[41].mxu0  ;;  %v7036_v46 = vld [vmem:[%s9935_s1 + $0x278] sm:$0xff] }
 0x850   :  { %v3330_v54 = vadd.f32 %v3329_v53, %v3256_v43  ;;  %v7035_v43 = vld [vmem:[%s9935_s1 + $0x270] sm:$0xff] }
 0x851   :  { %v3339_v56 = vmax.f32 %v3335_v48, 0.0 }
 0x852   :  { %v3338_v55 = vmax.f32 %v3330_v54, 0.0  ;;  %v7041_v54 = vld [vmem:[%s9935_s1 + $0x2a0] sm:$0xff] }
 0x854   :  { %7858 = vmatprep.mubr.msk.f32.mxu1 %vm3344_vm14, %v3338_v55  ;;  %v7042_v55 = vld [vmem:[%s9935_s1 + $0x2a8] sm:$0xff] }
 0x855   :  { %7859 = vmatmul.mubr.msk.f32.vlgmr.msra.gmra.mrb[36].mxu1 %vm3344_vm14, %v3339_v56 }
 0x856   :  { %8404 = vmatpush3.bf16.msra.mxu1 %v8401_v26  ;;  %v7013_v26 = vld [vmem:[%s9937_s3 + $0x18] sm:$0xff] }
 0x857   :  { %8406 = vmatprep.subr.bf16.mxu1 %v8405_v29 }
 0x85a   :  { %8408 = vmatpush3.bf16.msra.mxu1 %v8405_v29  ;;  %v8393_v29 = vpack.c.bf16 %v7022_v28, %v7021_v27 }
 0x85b   :  { %8418 = vmatprep.subr.bf16.mxu1 %v8417_v32 }
 0x928   :  { %v7860_v62 = vpop.f32.mrb[36].mxu1 }
 0x929   :  { %v3417_v2 = vpop.f32.mrb[37].mxu1  ;;  %v3423_v4 = vadd.f32 %v7860_v62, %v3343_v60  ;;  %v7043_v62 = vld [vmem:[%s9935_s1 + $0x2b0] sm:$0xff] }
 0x92a   :  { %v3418_v7 = vadd.f32 %v3417_v2, %v3343_v60  ;;  %v8433_v60 = vpack.c.bf16 %v7042_v55, %v7041_v54  ;;  %v7044_v2 = vld [vmem:[%s9935_s1 + $0x2b8] sm:$0xff]  ;;  %v7039_v54 = vld [vmem:[%s9935_s1 + $0x290] sm:$0xff] }
 0x92b   :  { %v3427_v10 = vadd.f32 %v3423_v4, %v3240_v41  ;;  %v8437_v4 = vpack.c.bf16 %v7044_v2, %v7043_v62  ;;  %v7040_v55 = vld [vmem:[%s9935_s1 + $0x298] sm:$0xff]  ;;  %v7046_v62 = vld [vmem:[%s9935_s1 + $0x2c8] sm:$0xff] }
 0x92c   :  { %v3426_v8 = vadd.f32 %v3418_v7, %v3239_v49  ;;  %v3463_v49 = vrot.slane %v9052_v63, %v3462_v38  ;;  %v8421_v63 = vpack.c.bf16 %v7036_v46, %v7035_v43  ;;  %v7049_v7 = vld [vmem:[%s9935_s1 + $0x2e0] sm:$0xff]  ;;  %v7038_v43 = vld [vmem:[%s9935_s1 + $0x288] sm:$0xff] }
 0x92d   :  { %v3431_v57 = vsel %vm112_vm1, %v3427_v10, 0.0 }
 0x92e   :  { %v3428_v9 = vsel %vm112_vm1, %v3426_v8, 0.0 }
 0x92f   :  { %3429 = vadd.xlane.f32.xlu1 %v3428_v9  ;;  %v7051_v9 = vld [vmem:[%s9935_s1 + $0x2f0] sm:$0xff] }
 0x933   :  { %3432 = vadd.xlane.f32.xlu1 %v3431_v57 }
 0x9bc   :  { %v3430_v11 = vpop.xlane.xlu1 %3429 }
 0x9bd   :  { %v3434_v13 = vmul.f32 0.03125, %v3430_v11  ;;  %v7057_v11 = vld [vmem:[%s9935_s1 + $0x320] sm:$0xff] }
 0x9bf   :  { %v3436_v14 = vsub.f32 %v3426_v8, %v3434_v13  ;;  %v7050_v8 = vld [vmem:[%s9935_s1 + $0x2e8] sm:$0xff] }
 0x9c0   :  { %v3433_v16 = vpop.xlane.xlu1 %3432  ;;  %v7058_v13 = vld [vmem:[%s9935_s1 + $0x328] sm:$0xff] }
 0x9c1   :  { %v3435_v17 = vmul.f32 0.03125, %v3433_v16  ;;  %v3438_v20 = vmul.f32 %v3436_v14, %v3436_v14  ;;  %v7059_v16 = vld [vmem:[%s9935_s1 + $0x330] sm:$0xff] }
 0x9c3   :  { %v3437_v21 = vsub.f32 %v3427_v10, %v3435_v17  ;;  %v3440_v36 = vsel %vm112_vm1, %v3438_v20, 0.0  ;;  %v7052_v10 = vld [vmem:[%s9935_s1 + $0x2f8] sm:$0xff] }
 0x9c4   :  { %3441 = vadd.xlane.f32.xlu1 %v3440_v36  ;;  %v8453_v57 = vpack.c.bf16 %v7052_v10, %v7051_v9  ;;  %v7060_v17 = vld [vmem:[%s9935_s1 + $0x338] sm:$0xff]  ;;  %v7066_v36 = vld [vmem:[%s9935_s1 + $0x368] sm:$0xff]  ;;  %v7053_v10 = vld [vmem:[%s9935_s1 + $0x300] sm:$0xff] }
 0x9c5   :  { %v3439_v22 = vmul.f32 %v3437_v21, %v3437_v21  ;;  %v8469_v20 = vpack.c.bf16 %v7060_v17, %v7059_v16  ;;  %v7055_v16 = vld [vmem:[%s9935_s1 + $0x310] sm:$0xff]  ;;  %v7056_v17 = vld [vmem:[%s9935_s1 + $0x318] sm:$0xff] }
 0x9c7   :  { %v3443_v23 = vsel %vm112_vm1, %v3439_v22, 0.0 }
 0x9c8   :  { %3444 = vadd.xlane.f32.xlu0 %v3443_v23  ;;  %v7067_v23 = vld [vmem:[%s9935_s1 + $0x370] sm:$0xff] }
 0x9c9   :  { %v8485_v25 = vpack.c.bf16 %v7068_v24, %v7067_v23 }
 0xa51   :  { %v3442_v0 = vpop.xlane.xlu1 %3441 }
 0xa52   :  { %v3446_v33 = vmul.f32 0.03125, %v3442_v0  ;;  %v7024_v0 = vld [vmem:[%s9935_s1 + $0x218] sm:$0xff] }
 0xa54   :  { %v3448_v47 = vadd.f32 1e-05, %v3446_v33 }
 0xa55   :  { %v3445_v35 = vpop.xlane.xlu0 %3444 }
 0xa56   :  { %8638 = vrsqrt.f32 %v3448_v47  ;;  %v3447_v37 = vmul.f32 0.03125, %v3445_v35  ;;  %v7029_v35 = vld [vmem:[%s9935_s1 + $0x240] sm:$0xff] }
 0xa58   :  { %v3449_v45 = vadd.f32 1e-05, %v3447_v37  ;;  %v7030_v37 = vld [vmem:[%s9935_s1 + $0x248] sm:$0xff] }
 0xa5a   :  { %8640 = vrsqrt.f32 %v3449_v45 }
 0xa60   :  { %v8639_v40 = vpop.eup %8638 }
 0xa61   :  { %v3452_v52 = vmul.f32 %v8639_v40, %v3436_v14  ;;  %v8465_v14 = vpack.c.bf16 %v7058_v13, %v7057_v11  ;;  %v8409_v40 = vpack.c.bf16 %v7030_v37, %v7029_v35 }
 0xa63   :  { %v3458_v41 = vmul.f32 %v3457_v39, %v3452_v52  ;;  %v7031_v52 = vld [vmem:[%s9935_s1 + $0x250] sm:$0xff] }
 0xa64   :  { %v8641_v50 = vpop.eup %8640 }
 0xa65   :  { %v9362_v42 = vadd.f32 %v3463_v49, %v3458_v41  ;;  %v3453_v1 = vmul.f32 %v8641_v50, %v3437_v21  ;;  %v7065_v21 = vld [vmem:[%s9935_s1 + $0x360] sm:$0xff]  ;;  %v7032_v41 = vld [vmem:[%s9935_s1 + $0x258] sm:$0xff] }
 0xa66   :  { %v8481_v22 = vpack.c.bf16 %v7066_v36, %v7065_v21  ;;  %v8413_v50 = vpack.c.bf16 %v7032_v41, %v7031_v52  ;;  %v7061_v21 = vld [vmem:[%s9935_s1 + $0x340] sm:$0xff]  ;;  %v7062_v36 = vld [vmem:[%s9935_s1 + $0x348] sm:$0xff] }
 0xa67   :  { %v3459_v48 = vmul.f32 %v3457_v39, %v3453_v1  ;;  %7892 = vmatprep.mubr.msk.f32.mxu1 %vm112_vm1, %v9362_v42  ;;  %v7037_v1 = vld [vmem:[%s9935_s1 + $0x280] sm:$0xff]  ;;  %v8473_v23 = vpack.c.bf16 %v7062_v36, %v7061_v21 }
 0xa69   :  { %v9372_v53 = vadd.f32 %v3463_v49, %v3459_v48  ;;  %v8425_v48 = vpack.c.bf16 %v7038_v43, %v7037_v1 }
 0xa6b   :  { %7893 = vmatmul.mubr.msk.f32.vlgmr.msra.gmra.mrb[38].mxu1 %vm112_vm1, %v9372_v53  ;;  %v8391_v56 = vpack.c.bf16 %v9372_v53, %v9362_v42 }
 0xa6c   :  { %8420 = vmatpush3.bf16.msra.mxu1 %v8417_v32  ;;  %7914 = vmatprep.mubr.msk.f32.mxu1 %vm112_vm1, %v9362_v42  ;;  %v7023_v32 = vld [vmem:[%s9935_s1 + $0x210] sm:$0xff] }
 0xa6d   :  { %8392 = vmatpush3.bf16.msra.mxu0 %v8391_v56  ;;  %8422 = vmatprep.subr.bf16.mxu1 %v8421_v63  ;;  %v8397_v33 = vpack.c.bf16 %v7024_v0, %v7023_v32  ;;  %v8429_v56 = vpack.c.bf16 %v7040_v55, %v7039_v54 }
 0xa6e   :  { %7868 = vmatprep.subr.mxu0 %v8716_v5 }
 0xa70   :  { %8424 = vmatpush3.bf16.msra.mxu1 %v8421_v63  ;;  %7866 = vmatmul.mubr.msk.f32.vlgmr.msra.gmra.mrb[42].mxu0 %vm34_vm4, %v8775_v12  ;;  %v8449_v12 = vpack.c.bf16 %v7050_v8, %v7049_v7  ;;  %v7047_v8 = vld [vmem:[%s9935_s1 + $0x2d0] sm:$0xff] }
 0xa71   :  { %8434 = vmatprep.subr.bf16.mxu1 %v8433_v60  ;;  %7870 = vmatprep.mubr.msk.f32.mxu0 %vm8715_vm0, %v8716_v5 }
 0xa73   :  { %7915 = vmatmul.mubr.msk.f32.vlgmr.msra.gmra.mrb[40].mxu1 %vm112_vm1, %v9372_v53 }
 0xa74   :  { %8436 = vmatpush3.bf16.msra.mxu1 %v8433_v60  ;;  %7936 = vmatprep.mubr.msk.f32.mxu1 %vm112_vm1, %v9362_v42  ;;  %v7045_v60 = vld [vmem:[%s9935_s1 + $0x2c0] sm:$0xff] }
 0xa75   :  { %8438 = vmatprep.subr.bf16.mxu1 %v8437_v4 }
 0xa76   :  { %7869 = vmatpush3.xpose.msk.msra.mxu0 %vm112_vm1, %v7013_v26  ;;  %v7064_v26 = vld [vmem:[%s9935_s1 + $0x358] sm:$0xff] }
 0xa77   :  { %8394 = vmatprep.subr.bf16.mxu0 %v8393_v29 }
 0xa78   :  { %8440 = vmatpush3.bf16.msra.mxu1 %v8437_v4  ;;  %v8441_v4 = vpack.c.bf16 %v7046_v62, %v7045_v60 }
 0xa79   :  { %8450 = vmatprep.subr.bf16.mxu1 %v8449_v12 }
 0xa7b   :  { %7937 = vmatmul.mubr.msk.f32.vlgmr.msra.gmra.mrb[42].mxu1 %vm112_vm1, %v9372_v53 }
 0xa7c   :  { %8452 = vmatpush3.bf16.msra.mxu1 %v8449_v12  ;;  %7958 = vmatprep.mubr.msk.f32.mxu1 %vm112_vm1, %v9362_v42  ;;  %v7048_v12 = vld [vmem:[%s9935_s1 + $0x2d8] sm:$0xff] }
 0xa7d   :  { %8454 = vmatprep.subr.bf16.mxu1 %v8453_v57  ;;  %v8445_v9 = vpack.c.bf16 %v7048_v12, %v7047_v8 }
 0xa80   :  { %8456 = vmatpush3.bf16.msra.mxu1 %v8453_v57  ;;  %v7054_v57 = vld [vmem:[%s9935_s1 + $0x308] sm:$0xff] }
 0xa81   :  { %8466 = vmatprep.subr.bf16.mxu1 %v8465_v14  ;;  %v8457_v13 = vpack.c.bf16 %v7054_v57, %v7053_v10 }
 0xa83   :  { %7959 = vmatmul.mubr.msk.f32.vlgmr.msra.gmra.mrb[44].mxu1 %vm112_vm1, %v9372_v53 }
 0xa84   :  { %8468 = vmatpush3.bf16.msra.mxu1 %v8465_v14  ;;  %7980 = vmatprep.mubr.msk.f32.mxu1 %vm112_vm1, %v9362_v42 }
 0xa85   :  { %8470 = vmatprep.subr.bf16.mxu1 %v8469_v20 }
 0xa88   :  { %8472 = vmatpush3.bf16.msra.mxu1 %v8469_v20  ;;  %v8461_v20 = vpack.c.bf16 %v7056_v17, %v7055_v16 }
 0xa89   :  { %8482 = vmatprep.subr.bf16.mxu1 %v8481_v22 }
 0xa8b   :  { %7981 = vmatmul.mubr.msk.f32.vlgmr.msra.gmra.mrb[46].mxu1 %vm112_vm1, %v9372_v53 }
 0xa8c   :  { %8484 = vmatpush3.bf16.msra.mxu1 %v8481_v22  ;;  %8002 = vmatprep.mubr.msk.f32.mxu1 %vm112_vm1, %v9362_v42 }
 0xa8d   :  { %8486 = vmatprep.subr.bf16.mxu1 %v8485_v25 }
 0xa90   :  { %8488 = vmatpush3.bf16.msra.mxu1 %v8485_v25  ;;  %v7063_v25 = vld [vmem:[%s9935_s1 + $0x350] sm:$0xff] }
 0xa91   :  { %8010 = vmatprep.subr.mxu1 %v8716_v5  ;;  %v8477_v27 = vpack.c.bf16 %v7064_v26, %v7063_v25 }
 0xa93   :  { %8003 = vmatmul.mubr.msk.f32.vlgmr.msra.gmra.mrb[48].mxu1 %vm112_vm1, %v9372_v53 }
 0xa94   :  { %8012 = vmatprep.mubr.msk.f32.mxu1 %vm8715_vm0, %v8716_v5 }
 0xb3e   :  { %v9464_v30 = vpop.f32.mrb[38].mxu1 }
 0xb3f   :  { %v9466_v31 = vpop.f32.mrb[39].mxu1 }
 0xb43   :  { %v3535_v47 = vpop.f32.mrb[42].mxu0 }
 0xb44   :  { %v7867_v45 = vpop.f32.mrb[43].mxu0  ;;  %7871 = vmatmul.mubr.msk.f32.vlgmr.msra.gmra.mrb[44].mxu0 %vm112_vm1, %v3535_v47 }
 0xb45   :  { %8396 = vmatpush3.bf16.msra.mxu0 %v8393_v29  ;;  %7881 = vmatprep.mubr.msk.f32.mxu0 %vm112_vm1, %v9362_v42 }
 0xb46   :  { %v9483_v39 = vpop.f32.mrb[40].mxu1  ;;  %8398 = vmatprep.subr.bf16.mxu0 %v8397_v33 }
 0xb47   :  { %v9485_v49 = vpop.f32.mrb[41].mxu1 }
 0xb49   :  { %8400 = vmatpush3.bf16.msra.mxu0 %v8397_v33 }
 0xb4a   :  { %8410 = vmatprep.subr.bf16.mxu0 %v8409_v40 }
 0xb4c   :  { %7882 = vmatmul.mubr.msk.f32.vlgmr.msra.gmra.mrb[46].mxu0 %vm112_vm1, %v9372_v53 }
 0xb4d   :  { %8412 = vmatpush3.bf16.msra.mxu0 %v8409_v40  ;;  %7903 = vmatprep.mubr.msk.f32.mxu0 %vm112_vm1, %v9362_v42 }
 0xb4e   :  { %v9503_v46 = vpop.f32.mrb[42].mxu1  ;;  %8414 = vmatprep.subr.bf16.mxu0 %v8413_v50 }
 0xb4f   :  { %v9505_v63 = vpop.f32.mrb[43].mxu1 }
 0xb51   :  { %8416 = vmatpush3.bf16.msra.mxu0 %v8413_v50 }
 0xb52   :  { %8426 = vmatprep.subr.bf16.mxu0 %v8425_v48 }
 0xb54   :  { %7904 = vmatmul.mubr.msk.f32.vlgmr.msra.gmra.mrb[48].mxu0 %vm112_vm1, %v9372_v53 }
 0xb55   :  { %8428 = vmatpush3.bf16.msra.mxu0 %v8425_v48  ;;  %7925 = vmatprep.mubr.msk.f32.mxu0 %vm112_vm1, %v9362_v42 }
 0xb56   :  { %v9523_v2 = vpop.f32.mrb[44].mxu1  ;;  %8430 = vmatprep.subr.bf16.mxu0 %v8429_v56 }
 0xb57   :  { %v9525_v7 = vpop.f32.mrb[45].mxu1 }
 0xb59   :  { %8432 = vmatpush3.bf16.msra.mxu0 %v8429_v56 }
 0xb5a   :  { %8442 = vmatprep.subr.bf16.mxu0 %v8441_v4 }
 0xb5c   :  { %7926 = vmatmul.mubr.msk.f32.vlgmr.msra.gmra.mrb[50].mxu0 %vm112_vm1, %v9372_v53 }
 0xb5d   :  { %8444 = vmatpush3.bf16.msra.mxu0 %v8441_v4  ;;  %7947 = vmatprep.mubr.msk.f32.mxu0 %vm112_vm1, %v9362_v42 }
 0xb5e   :  { %v9543_v11 = vpop.f32.mrb[46].mxu1  ;;  %8446 = vmatprep.subr.bf16.mxu0 %v8445_v9 }
 0xb5f   :  { %v9545_v14 = vpop.f32.mrb[47].mxu1 }
 0xb61   :  { %8448 = vmatpush3.bf16.msra.mxu0 %v8445_v9 }
 0xb62   :  { %8458 = vmatprep.subr.bf16.mxu0 %v8457_v13 }
 0xb64   :  { %7948 = vmatmul.mubr.msk.f32.vlgmr.msra.gmra.mrb[52].mxu0 %vm112_vm1, %v9372_v53 }
 0xb65   :  { %8460 = vmatpush3.bf16.msra.mxu0 %v8457_v13  ;;  %7969 = vmatprep.mubr.msk.f32.mxu0 %vm112_vm1, %v9362_v42 }
 0xb66   :  { %v9563_v22 = vpop.f32.mrb[48].mxu1  ;;  %8462 = vmatprep.subr.bf16.mxu0 %v8461_v20 }
 0xb67   :  { %v9565_v24 = vpop.f32.mrb[49].mxu1 }
 0xb69   :  { %8464 = vmatpush3.bf16.msra.mxu0 %v8461_v20 }
 0xb6a   :  { %8474 = vmatprep.subr.bf16.mxu0 %v8473_v23 }
 0xb6c   :  { %7970 = vmatmul.mubr.msk.f32.vlgmr.msra.gmra.mrb[54].mxu0 %vm112_vm1, %v9372_v53 }
 0xb6d   :  { %8476 = vmatpush3.bf16.msra.mxu0 %v8473_v23  ;;  %7991 = vmatprep.mubr.msk.f32.mxu0 %vm112_vm1, %v9362_v42 }
 0xb6e   :  { %8478 = vmatprep.subr.bf16.mxu0 %v8477_v27 }
 0xb71   :  { %8480 = vmatpush3.bf16.msra.mxu0 %v8477_v27 }
 0xb72   :  { %8005 = vmatprep.subr.mxu0 %v8716_v5 }
 0xb74   :  { %7992 = vmatmul.mubr.msk.f32.vlgmr.msra.gmra.mrb[56].mxu0 %vm112_vm1, %v9372_v53 }
 0xb75   :  { %8007 = vmatprep.mubr.msk.f32.mxu0 %vm8715_vm0, %v8716_v5 }
 0xc17   :  { %v9582_v28 = vpop.f32.mrb[44].mxu0 }
 0xc18   :  { %v7872_v29 = vpop.f32.mrb[45].mxu0 }
 0xc1f   :  { %v7883_v32 = vpop.f32.mrb[46].mxu0 }
 0xc20   :  { %v3807_v0 = vpop.f32.mrb[47].mxu0 }
 0xc27   :  { %v7905_v33 = vpop.f32.mrb[48].mxu0 }
 0xc28   :  { %v3957_v47 = vpop.f32.mrb[49].mxu0 }
 0xc2f   :  { %v7927_v35 = vpop.f32.mrb[50].mxu0 }
 0xc30   :  { %v4107_v37 = vpop.f32.mrb[51].mxu0  ;;  %8011 = vmatpush3.xpose.msk.msra.mxu1 %vm1211_vm6, %v7927_v35 }
 0xc31   :  { %8006 = vmatpush3.xpose.msk.msra.mxu0 %vm1211_vm6, %v4107_v37  ;;  %8020 = vmatprep.subr.mxu1 %v8716_v5 }
 0xc32   :  { %8015 = vmatprep.subr.mxu0 %v8716_v5 }
 0xc33   :  { %8013 = vmatmul.mubr.msk.f32.vlgmr.msra.gmra.mrb[50].mxu1 %vm1211_vm6, %v7883_v32 }
 0xc34   :  { %8008 = vmatmul.mubr.msk.f32.vlgmr.msra.gmra.mrb[58].mxu0 %vm1211_vm6, %v3807_v0  ;;  %8021 = vmatpush3.xpose.msk.msra.mxu1 %vm1211_vm6, %v9503_v46 }
 0xc35   :  { %8016 = vmatpush3.xpose.msk.msra.mxu0 %vm1211_vm6, %v9505_v63  ;;  %8022 = vmatprep.mubr.msk.f32.mxu1 %vm8715_vm0, %v8716_v5 }
 0xc36   :  { %8017 = vmatprep.mubr.msk.f32.mxu0 %vm8715_vm0, %v8716_v5  ;;  %8030 = vmatprep.subr.mxu1 %v8716_v5 }
 0xc37   :  { %v7949_v45 = vpop.f32.mrb[52].mxu0  ;;  %8023 = vmatmul.mubr.msk.f32.vlgmr.msra.gmra.mrb[52].mxu1 %vm1211_vm6, %v9464_v30  ;;  %8025 = vmatprep.subr.mxu0 %v8716_v5 }
 0xc38   :  { %v4257_v40 = vpop.f32.mrb[53].mxu0  ;;  %8018 = vmatmul.mubr.msk.f32.vlgmr.msra.gmra.mrb[60].mxu0 %vm1211_vm6, %v9466_v31  ;;  %8031 = vmatpush3.xpose.msk.msra.mxu1 %vm1211_vm6, %v7949_v45 }
 0xc39   :  { %8026 = vmatpush3.xpose.msk.msra.mxu0 %vm1211_vm6, %v4257_v40  ;;  %8032 = vmatprep.mubr.msk.f32.mxu1 %vm8715_vm0, %v8716_v5 }
 0xc3a   :  { %8027 = vmatprep.mubr.msk.f32.mxu0 %vm8715_vm0, %v8716_v5  ;;  %8040 = vmatprep.subr.mxu1 %v8716_v5 }
 0xc3b   :  { %8033 = vmatmul.mubr.msk.f32.vlgmr.msra.gmra.mrb[54].mxu1 %vm1211_vm6, %v7905_v33  ;;  %8035 = vmatprep.subr.mxu0 %v8716_v5 }
 0xc3c   :  { %8028 = vmatmul.mubr.msk.f32.vlgmr.msra.gmra.mrb[62].mxu0 %vm1211_vm6, %v3957_v47  ;;  %8041 = vmatpush3.xpose.msk.msra.mxu1 %vm1211_vm6, %v9523_v2 }
 0xc3d   :  { %8036 = vmatpush3.xpose.msk.msra.mxu0 %vm1211_vm6, %v9525_v7  ;;  %8042 = vmatprep.mubr.msk.f32.mxu1 %vm8715_vm0, %v8716_v5 }
 0xc3e   :  { %8037 = vmatprep.mubr.msk.f32.mxu0 %vm8715_vm0, %v8716_v5  ;;  %8050 = vmatprep.subr.mxu1 %v8716_v5 }
 0xc3f   :  { %v7971_v30 = vpop.f32.mrb[54].mxu0  ;;  %8043 = vmatmul.mubr.msk.f32.vlgmr.msra.gmra.mrb[56].mxu1 %vm1211_vm6, %v9483_v39  ;;  %8045 = vmatprep.subr.mxu0 %v8716_v5 }
 0xc40   :  { %v4407_v31 = vpop.f32.mrb[55].mxu0  ;;  %8038 = vmatmul.mubr.msk.f32.vlgmr.msra.gmra.mrb[64].mxu0 %vm1211_vm6, %v9485_v49  ;;  %8051 = vmatpush3.msra.mxu1 %v7971_v30 }
 0xc41   :  { %8046 = vmatpush3.msra.mxu0 %v4407_v31  ;;  %8052 = vmatprep.mubr.msk.f32.mxu1 %vm8715_vm0, %v8716_v5 }
 0xc42   :  { %8060 = vmatprep.subr.mxu1 %v8716_v5  ;;  %8047 = vmatprep.mubr.msk.f32.mxu0 %vm8715_vm0, %v8716_v5 }
 0xc43   :  { %8055 = vmatprep.subr.mxu0 %v8716_v5 }
 0xc47   :  { %v9634_v52 = vpop.f32.mrb[56].mxu0 }
 0xc48   :  { %v9636_v39 = vpop.f32.mrb[57].mxu0 }
 0xd06   :  { %v4789_v41 = vpop.f32.mrb[50].mxu1 }
 0xd07   :  { %v5250_v50 = vmul.f32 0.35355338, %v4789_v41  ;;  %v4713_v1 = vpop.f32.mrb[58].mxu0  ;;  %v8014_v49 = vpop.f32.mrb[51].mxu1 }
 0xd08   :  { %v5249_v43 = vmul.f32 0.35355338, %v4713_v1  ;;  %v8009_v46 = vpop.f32.mrb[59].mxu0 }
 0xd09   :  { %v5260_v48 = vsel %vm1211_vm6, %v5250_v50, -inf }
 0xd0a   :  { %5261 = vmax.xlane.f32.xlu0 %v5260_v48  ;;  %v4941_v63 = vpop.f32.mrb[52].mxu1  ;;  %v5257_v54 = vsel %vm1211_vm6, %v5249_v43, -inf }
 0xd0b   :  { %v5252_v55 = vmul.f32 0.35355338, %v4941_v63  ;;  %v8024_v56 = vpop.f32.mrb[53].mxu1  ;;  %5258 = vmax.xlane.f32.xlu1 %v5257_v54  ;;  %v4865_v60 = vpop.f32.mrb[60].mxu0 }
 0xd0c   :  { %v5251_v62 = vmul.f32 0.35355338, %v4865_v60  ;;  %v8019_v2 = vpop.f32.mrb[61].mxu0 }
 0xd0d   :  { %v5266_v4 = vsel %vm1211_vm6, %v5252_v55, -inf }
 0xd0e   :  { %5267 = vmax.xlane.f32.xlu0 %v5266_v4  ;;  %v5093_v7 = vpop.f32.mrb[54].mxu1  ;;  %v5263_v8 = vsel %vm1211_vm6, %v5251_v62, -inf }
 0xd0f   :  { %v5254_v12 = vmul.f32 0.35355338, %v5093_v7  ;;  %v8034_v9 = vpop.f32.mrb[55].mxu1  ;;  %5264 = vmax.xlane.f32.xlu1 %v5263_v8  ;;  %v5017_v10 = vpop.f32.mrb[62].mxu0 }
 0xd10   :  { %v5253_v57 = vmul.f32 0.35355338, %v5017_v10  ;;  %v8029_v13 = vpop.f32.mrb[63].mxu0 }
 0xd11   :  { %v5272_v16 = vsel %vm1211_vm6, %v5254_v12, -inf }
 0xd12   :  { %5273 = vmax.xlane.f32.xlu0 %v5272_v16  ;;  %v5245_v17 = vpop.f32.mrb[56].mxu1  ;;  %v5269_v20 = vsel %vm1211_vm6, %v5253_v57, -inf  ;;  %v9653_v16 = vld [vmem:[%s9937_s3 + $0x10] sm:$0xff] }
 0xd13   :  { %v5256_v21 = vmul.f32 0.35355338, %v5245_v17  ;;  %v8044_v36 = vpop.f32.mrb[57].mxu1  ;;  %5270 = vmax.xlane.f32.xlu1 %v5269_v20  ;;  %v5169_v23 = vpop.f32.mrb[64].mxu0 }
 0xd14   :  { %v5255_v25 = vmul.f32 0.35355338, %v5169_v23  ;;  %v8039_v26 = vpop.f32.mrb[65].mxu0  ;;  %v3542_v36 = vrot.slane %v9653_v16, %v9046_v61 }
 0xd15   :  { %v5278_v27 = vsel %vm1211_vm6, %v5256_v21, -inf }
 0xd16   :  { %5279 = vmax.xlane.f32.xlu0 %v5278_v27  ;;  %v5275_v29 = vsel %vm1211_vm6, %v5255_v25, -inf }
 0xd17   :  { %5276 = vmax.xlane.f32.xlu1 %v5275_v29  ;;  %v3616_v29 = vadd.f32 %v9582_v28, %v3542_v36 }
 0xd97   :  { %v5262_v32 = vpop.xlane.xlu0 %5261 }
 0xd98   :  { %v5282_v0 = vsub.f32 %v5250_v50, %v5262_v32  ;;  %v5259_v33 = vpop.xlane.xlu1 %5258 }
 0xd99   :  { %v5281_v47 = vsub.f32 %v5249_v43, %v5259_v33 }
 0xd9a   :  { %v5291_v35 = vmul.f32 1.442695, %v5282_v0  ;;  %v3619_v0 = vsel %vm189_vm7, %v3616_v29, -inf }
 0xd9b   :  { %v5289_v37 = vmul.f32 1.442695, %v5281_v47  ;;  %v5268_v45 = vpop.xlane.xlu0 %5267 }
 0xd9c   :  { %8642 = vpow2.f32 %v5291_v35  ;;  %v5284_v40 = vsub.f32 %v5252_v55, %v5268_v45  ;;  %v5265_v30 = vpop.xlane.xlu1 %5264 }
 0xd9d   :  { %8644 = vpow2.f32 %v5289_v37  ;;  %v5283_v31 = vsub.f32 %v5251_v62, %v5265_v30 }
 0xd9e   :  { %v5295_v41 = vmul.f32 1.442695, %v5284_v40 }
 0xd9f   :  { %v5293_v1 = vmul.f32 1.442695, %v5283_v31  ;;  %v5274_v49 = vpop.xlane.xlu0 %5273 }
 0xda0   :  { %8646 = vpow2.f32 %v5295_v41  ;;  %v5286_v46 = vsub.f32 %v5254_v12, %v5274_v49  ;;  %v5271_v48 = vpop.xlane.xlu1 %5270 }
 0xda1   :  { %8648 = vpow2.f32 %v5293_v1  ;;  %v5285_v63 = vsub.f32 %v5253_v57, %v5271_v48 }
 0xda2   :  { %v5299_v54 = vmul.f32 1.442695, %v5286_v46 }
 0xda3   :  { %v5297_v50 = vmul.f32 1.442695, %v5285_v63  ;;  %v5280_v56 = vpop.xlane.xlu0 %5279 }
 0xda4   :  { %8650 = vpow2.f32 %v5299_v54  ;;  %v5288_v43 = vsub.f32 %v5256_v21, %v5280_v56  ;;  %v5277_v60 = vpop.xlane.xlu1 %5276 }
 0xda5   :  { %8652 = vpow2.f32 %v5297_v50  ;;  %v5287_v2 = vsub.f32 %v5255_v25, %v5277_v60 }
 0xda6   :  { %v8643_v55 = vpop.eup %8642  ;;  %v5303_v4 = vmul.f32 1.442695, %v5288_v43 }
 0xda7   :  { %v8645_v7 = vpop.eup %8644  ;;  %v5301_v62 = vmul.f32 1.442695, %v5287_v2  ;;  %v5308_v8 = vsel %vm1211_vm6, %v8643_v55, 0.0 }
 0xda8   :  { %8654 = vpow2.f32 %v5303_v4  ;;  %5309 = vadd.xlane.f32.xlu0 %v5308_v8  ;;  %v5305_v12 = vsel %vm1211_vm6, %v8645_v7, 0.0 }
 0xda9   :  { %8656 = vpow2.f32 %v5301_v62  ;;  %5306 = vadd.xlane.f32.xlu1 %v5305_v12  ;;  %v7070_v62 = vld [vmem:[%s9935_s1 + $0x388] sm:$0xff]  ;;  %v7071_v12 = vld [vmem:[%s9935_s1 + $0x390] sm:$0xff] }
 0xdaa   :  { %v8647_v9 = vpop.eup %8646 }
 0xdab   :  { %v8649_v10 = vpop.eup %8648  ;;  %v5314_v57 = vsel %vm1211_vm6, %v8647_v9, 0.0 }
 0xdac   :  { %5315 = vadd.xlane.f32.xlu0 %v5314_v57  ;;  %v5311_v13 = vsel %vm1211_vm6, %v8649_v10, 0.0 }
 0xdad   :  { %5312 = vadd.xlane.f32.xlu1 %v5311_v13 }
 0xdae   :  { %v8651_v17 = vpop.eup %8650 }
 0xdaf   :  { %v8653_v20 = vpop.eup %8652  ;;  %v5320_v21 = vsel %vm1211_vm6, %v8651_v17, 0.0 }
 0xdb0   :  { %5321 = vadd.xlane.f32.xlu0 %v5320_v21  ;;  %v5317_v23 = vsel %vm1211_vm6, %v8653_v20, 0.0  ;;  %v7074_v21 = vld [vmem:[%s9935_s1 + $0x3a8] sm:$0xff] }
 0xdb1   :  { %5318 = vadd.xlane.f32.xlu1 %v5317_v23 }
 0xdb2   :  { %v8655_v25 = vpop.eup %8654 }
 0xdb3   :  { %v9659_v26 = vpop.eup %8656  ;;  %v5326_v27 = vsel %vm1211_vm6, %v8655_v25, 0.0 }
 0xdb4   :  { %5327 = vadd.xlane.f32.xlu0 %v5326_v27  ;;  %v5323_v32 = vsel %vm1211_vm6, %v9659_v26, 0.0  ;;  %v7076_v27 = vld [vmem:[%s9935_s1 + $0x3b8] sm:$0xff] }
 0xdb5   :  { %5324 = vadd.xlane.f32.xlu1 %v5323_v32 }
 0xdb9   :  { %3620 = vmax.xlane.f32.xlu1 %v3619_v0 }
 0xe35   :  { %v5310_v33 = vpop.xlane.xlu0 %5309 }
 0xe36   :  { %8658 = vrcp.f32 %v5310_v33  ;;  %v5307_v47 = vpop.xlane.xlu1 %5306 }
 0xe37   :  { %8660 = vrcp.f32 %v5307_v47 }
 0xe39   :  { %v5316_v35 = vpop.xlane.xlu0 %5315 }
 0xe3a   :  { %8662 = vrcp.f32 %v5316_v35  ;;  %v5313_v37 = vpop.xlane.xlu1 %5312 }
 0xe3b   :  { %8664 = vrcp.f32 %v5313_v37 }
 0xe3d   :  { %v5322_v45 = vpop.xlane.xlu0 %5321 }
 0xe3e   :  { %8666 = vrcp.f32 %v5322_v45  ;;  %v5319_v40 = vpop.xlane.xlu1 %5318 }
 0xe3f   :  { %8668 = vrcp.f32 %v5319_v40 }
 0xe40   :  { %v8659_v28 = vpop.eup %8658 }
 0xe41   :  { %v8661_v30 = vpop.eup %8660  ;;  %v5338_v31 = vmul.f32 %v8659_v28, %v8643_v55  ;;  %v5328_v41 = vpop.xlane.xlu0 %5327  ;;  %v7077_v28 = vld [vmem:[%s9935_s1 + $0x3c0] sm:$0xff] }
 0xe42   :  { %v5337_v1 = vmul.f32 %v8661_v30, %v8645_v7  ;;  %8670 = vrcp.f32 %v5328_v41  ;;  %v5325_v49 = vpop.xlane.xlu1 %5324  ;;  %v7069_v7 = vld [vmem:[%s9935_s1 + $0x380] sm:$0xff]  ;;  %v7078_v30 = vld [vmem:[%s9935_s1 + $0x3c8] sm:$0xff] }
 0xe43   :  { %8672 = vrcp.f32 %v5325_v49  ;;  %8053 = vmatmul.mubr.msk.f32.vlgmr.msra.gmra.mrb[58].mxu1 %vm1211_vm6, %v5338_v31  ;;  %v8490_v8 = vpack.c.bf16 %v7070_v62, %v7069_v7 }
 0xe44   :  { %v8663_v46 = vpop.eup %8662  ;;  %8061 = vmatpush3.msra.mxu1 %v9543_v11  ;;  %8048 = vmatmul.mubr.msk.f32.vlgmr.msra.gmra.mrb[66].mxu0 %vm1211_vm6, %v5337_v1 }
 0xe45   :  { %v8665_v48 = vpop.eup %8664  ;;  %v5340_v63 = vmul.f32 %v8663_v46, %v8647_v9  ;;  %8056 = vmatpush3.msra.mxu0 %v9545_v14  ;;  %8062 = vmatprep.mubr.msk.f32.mxu1 %vm8715_vm0, %v8716_v5  ;;  %v7072_v9 = vld [vmem:[%s9935_s1 + $0x398] sm:$0xff]  ;;  %v8522_v46 = vpack.c.bf16 %v7078_v30, %v7077_v28 }
 0xe46   :  { %v5339_v54 = vmul.f32 %v8665_v48, %v8649_v10  ;;  %8070 = vmatprep.subr.mxu1 %v8716_v5  ;;  %v3621_v50 = vpop.xlane.xlu1 %3620  ;;  %8057 = vmatprep.mubr.msk.f32.mxu0 %vm8715_vm0, %v8716_v5  ;;  %v8494_v10 = vpack.c.bf16 %v7072_v9, %v7071_v12  ;;  %v7079_v48 = vld [vmem:[%s9935_s1 + $0x3d0] sm:$0xff] }
 0xe47   :  { %v3622_v56 = vsub.f32 %v3616_v29, %v3621_v50  ;;  %8063 = vmatmul.mubr.msk.f32.vlgmr.msra.gmra.mrb[60].mxu1 %vm1211_vm6, %v5340_v63  ;;  %8065 = vmatprep.subr.mxu0 %v8716_v5  ;;  %v7080_v63 = vld [vmem:[%s9935_s1 + $0x3d8] sm:$0xff]  ;;  %v7081_v50 = vld [vmem:[%s9935_s1 + $0x3e0] sm:$0xff] }
 0xe48   :  { %v8667_v11 = vpop.eup %8666  ;;  %8071 = vmatpush3.msra.mxu1 %v9634_v52  ;;  %8058 = vmatmul.mubr.msk.f32.vlgmr.msra.gmra.mrb[68].mxu0 %vm1211_vm6, %v5339_v54  ;;  %v8526_v54 = vpack.c.bf16 %v7080_v63, %v7079_v48 }
 0xe49   :  { %v8669_v14 = vpop.eup %8668  ;;  %v5342_v43 = vmul.f32 %v8667_v11, %v8651_v17  ;;  %v3623_v60 = vmul.f32 1.442695, %v3622_v56  ;;  %8066 = vmatpush3.msra.mxu0 %v9636_v39  ;;  %8072 = vmatprep.mubr.msk.f32.mxu1 %vm8715_vm0, %v8716_v5  ;;  %v7082_v56 = vld [vmem:[%s9935_s1 + $0x3e8] sm:$0xff] }
 0xe4a   :  { %v5341_v2 = vmul.f32 %v8669_v14, %v8653_v20  ;;  %8080 = vmatprep.subr.mxu1 %v8716_v5  ;;  %8067 = vmatprep.mubr.msk.f32.mxu0 %vm8715_vm0, %v8716_v5  ;;  %v7073_v20 = vld [vmem:[%s9935_s1 + $0x3a0] sm:$0xff]  ;;  %v8538_v11 = vpack.c.bf16 %v7082_v56, %v7081_v50  ;;  %v7083_v14 = vld [vmem:[%s9935_s1 + $0x3f0] sm:$0xff] }
 0xe4b   :  { %8674 = vpow2.f32 %v3623_v60  ;;  %8073 = vmatmul.mubr.msk.f32.vlgmr.msra.gmra.mrb[62].mxu1 %vm1211_vm6, %v5342_v43  ;;  %8075 = vmatprep.subr.mxu0 %v8716_v5  ;;  %v8506_v36 = vpack.c.bf16 %v7074_v21, %v7073_v20  ;;  %v7084_v43 = vld [vmem:[%s9935_s1 + $0x3f8] sm:$0xff] }
 0xe4c   :  { %v8671_v52 = vpop.eup %8670  ;;  %8081 = vmatpush3.msra.mxu1 %v9563_v22  ;;  %8068 = vmatmul.mubr.msk.f32.vlgmr.msra.gmra.mrb[70].mxu0 %vm1211_vm6, %v5341_v2  ;;  %v8542_v60 = vpack.c.bf16 %v7084_v43, %v7083_v14 }
 0xe4d   :  { %v8673_v39 = vpop.eup %8672  ;;  %v5344_v55 = vmul.f32 %v8671_v52, %v8655_v25  ;;  %8076 = vmatpush3.msra.mxu0 %v9565_v24  ;;  %8082 = vmatprep.mubr.msk.f32.mxu1 %vm8715_vm0, %v8716_v5 }
 0xe4e   :  { %v5343_v4 = vmul.f32 %v8673_v39, %v9659_v26  ;;  %8077 = vmatprep.mubr.msk.f32.mxu0 %vm8715_vm0, %v8716_v5  ;;  %8497 = vmatprep.subr.bf16.mxu1 %v8714_v3  ;;  %v7075_v26 = vld [vmem:[%s9935_s1 + $0x3b0] sm:$0xff] }
 0xe4f   :  { %8083 = vmatmul.mubr.msk.f32.vlgmr.msra.gmra.mrb[64].mxu1 %vm1211_vm6, %v5344_v55  ;;  %8489 = vmatprep.subr.bf16.mxu0 %v8714_v3  ;;  %v8510_v47 = vpack.c.bf16 %v7076_v27, %v7075_v26 }
 0xe50   :  { %8078 = vmatmul.mubr.msk.f32.vlgmr.msra.gmra.mrb[72].mxu0 %vm1211_vm6, %v5343_v4  ;;  %8104 = vmatprep.mubr.msk.f32.mxu1 %vm8715_vm0, %v8716_v5 }
 0xe51   :  { %8093 = vmatprep.mubr.msk.f32.mxu0 %vm8715_vm0, %v8716_v5 }
 0xe53   :  { %8500 = vmatpush3.bf16.xpose.msk.msra.mxu1 %vm9112_vm8, %v8490_v8 }
 0xe54   :  { %8492 = vmatpush3.bf16.xpose.msk.msra.mxu0 %vm9112_vm8, %v8490_v8  ;;  %8501 = vmatprep.subr.bf16.mxu1 %v8714_v3 }
 0xe55   :  { %v8675_v22 = vpop.eup %8674  ;;  %8493 = vmatprep.subr.bf16.mxu0 %v8714_v3 }
 0xe56   :  { %v3625_v24 = vsel %vm189_vm7, %v8675_v22, 0.0 }
 0xe57   :  { %3626 = vadd.xlane.f32.xlu0 %v3625_v24 }
 0xe5b   :  { %8504 = vmatpush3.bf16.xpose.msk.msra.mxu1 %vm9112_vm8, %v8494_v10 }
 0xe5c   :  { %8496 = vmatpush3.bf16.xpose.msk.msra.mxu0 %vm9112_vm8, %v8494_v10  ;;  %8513 = vmatprep.subr.bf16.mxu1 %v8714_v3 }
 0xe5d   :  { %8505 = vmatprep.subr.bf16.mxu0 %v8714_v3 }
 0xee4   :  { %v3627_v57 = vpop.xlane.xlu0 %3626 }
 0xee5   :  { %8676 = vrcp.f32 %v3627_v57 }
 0xeef   :  { %v8677_v13 = vpop.eup %8676 }
 0xef0   :  { %v9728_v17 = vmul.f32 %v8677_v13, %v8675_v22 }
 0xef2   :  { %3640 = vperm.xlu0 %8592, %v9728_v17   ;;  %3632 = vperm.xlu1 %8591, %v9728_v17  }
 0xef6   :  { %8593 = vset.pattern.permute.xlu1 %v8719_v58  ;;  %8595 = vset.pattern.permute.xlu0 %v8720_v59 }
 0xef7   :  { %3648 = vperm.xlu1 %8593, %v9728_v17  }
 0xefb   :  { %8594 = vset.pattern.permute.xlu1 %v8720_v59 }
 0xefc   :  { %3656 = vperm.xlu1 %8594, %v9728_v17  }
 0xf16   :  { %v5487_v23 = vpop.f32.mrb[58].mxu1 }
 0xf17   :  { %v5414_v25 = vpop.f32.mrb[66].mxu0  ;;  %v8054_v58 = vpop.f32.mrb[59].mxu1  ;;  %8105 = vmatmul.mubr.msk.f32.vlgmr.msra.gmra.mrb[66].mxu1 %vm1211_vm6, %v5487_v23 }
 0xf18   :  { %8516 = vmatpush3.bf16.xpose.msk.msra.mxu1 %vm9112_vm8, %v8506_v36  ;;  %v8049_v59 = vpop.f32.mrb[67].mxu0  ;;  %8094 = vmatmul.mubr.msk.f32.vlgmr.msra.gmra.mrb[74].mxu0 %vm1211_vm6, %v5414_v25 }
 0xf19   :  { %8508 = vmatpush3.bf16.xpose.msk.msra.mxu0 %vm9112_vm8, %v8506_v36  ;;  %8517 = vmatprep.subr.bf16.mxu1 %v8714_v3 }
 0xf1a   :  { %v5633_v29 = vpop.f32.mrb[60].mxu1  ;;  %8509 = vmatprep.subr.bf16.mxu0 %v8714_v3  ;;  %8126 = vmatprep.mubr.msk.f32.mxu1 %vm8715_vm0, %v8716_v5 }
 0xf1b   :  { %v5560_v32 = vpop.f32.mrb[68].mxu0  ;;  %v8064_v0 = vpop.f32.mrb[61].mxu1  ;;  %8115 = vmatprep.mubr.msk.f32.mxu0 %vm8715_vm0, %v8716_v5 }
 0xf1c   :  { %v8059_v33 = vpop.f32.mrb[69].mxu0 }
 0xf1e   :  { %v5779_v35 = vpop.f32.mrb[62].mxu1 }
 0xf1f   :  { %v5706_v37 = vpop.f32.mrb[70].mxu0  ;;  %v8074_v45 = vpop.f32.mrb[63].mxu1 }
 0xf20   :  { %8520 = vmatpush3.bf16.xpose.msk.msra.mxu1 %vm9112_vm8, %v8510_v47  ;;  %v8069_v40 = vpop.f32.mrb[71].mxu0 }
 0xf21   :  { %8512 = vmatpush3.bf16.xpose.msk.msra.mxu0 %vm9112_vm8, %v8510_v47  ;;  %8529 = vmatprep.subr.bf16.mxu1 %v8714_v3 }
 0xf22   :  { %v5925_v31 = vpop.f32.mrb[64].mxu1  ;;  %8521 = vmatprep.subr.bf16.mxu0 %v8714_v3 }
 0xf23   :  { %v5852_v41 = vpop.f32.mrb[72].mxu0  ;;  %v8084_v1 = vpop.f32.mrb[65].mxu1 }
 0xf24   :  { %v8079_v49 = vpop.f32.mrb[73].mxu0 }
 0xf27   :  { %8127 = vmatmul.mubr.msk.f32.vlgmr.msra.gmra.mrb[68].mxu1 %vm1211_vm6, %v5633_v29 }
 0xf28   :  { %8116 = vmatmul.mubr.msk.f32.vlgmr.msra.gmra.mrb[76].mxu0 %vm1211_vm6, %v5560_v32  ;;  %8532 = vmatpush3.bf16.xpose.msk.msra.mxu1 %vm9112_vm8, %v8522_v46 }
 0xf29   :  { %8524 = vmatpush3.bf16.xpose.msk.msra.mxu0 %vm9112_vm8, %v8522_v46  ;;  %8533 = vmatprep.subr.bf16.mxu1 %v8714_v3 }
 0xf2a   :  { %8525 = vmatprep.subr.bf16.mxu0 %v8714_v3  ;;  %8148 = vmatprep.mubr.msk.f32.mxu1 %vm8715_vm0, %v8716_v5 }
 0xf2b   :  { %8137 = vmatprep.mubr.msk.f32.mxu0 %vm8715_vm0, %v8716_v5 }
 0xf30   :  { %8536 = vmatpush3.bf16.xpose.msk.msra.mxu1 %vm9112_vm8, %v8526_v54 }
 0xf31   :  { %8528 = vmatpush3.bf16.xpose.msk.msra.mxu0 %vm9112_vm8, %v8526_v54  ;;  %8545 = vmatprep.subr.bf16.mxu1 %v8714_v3 }
 0xf32   :  { %8537 = vmatprep.subr.bf16.mxu0 %v8714_v3 }
 0xf37   :  { %8149 = vmatmul.mubr.msk.f32.vlgmr.msra.gmra.mrb[70].mxu1 %vm1211_vm6, %v5779_v35 }
 0xf38   :  { %8138 = vmatmul.mubr.msk.f32.vlgmr.msra.gmra.mrb[78].mxu0 %vm1211_vm6, %v5706_v37  ;;  %8548 = vmatpush3.bf16.xpose.msk.msra.mxu1 %vm9112_vm8, %v8538_v11 }
 0xf39   :  { %8540 = vmatpush3.bf16.xpose.msk.msra.mxu0 %vm9112_vm8, %v8538_v11  ;;  %8549 = vmatprep.subr.bf16.mxu1 %v8714_v3 }
 0xf3a   :  { %8541 = vmatprep.subr.bf16.mxu0 %v8714_v3  ;;  %8170 = vmatprep.mubr.msk.f32.mxu1 %vm8715_vm0, %v8716_v5 }
 0xf3b   :  { %8159 = vmatprep.mubr.msk.f32.mxu0 %vm8715_vm0, %v8716_v5 }
 0xf40   :  { %8552 = vmatpush3.bf16.xpose.msk.msra.mxu1 %vm9112_vm8, %v8542_v60 }
 0xf41   :  { %8544 = vmatpush3.bf16.xpose.msk.msra.mxu0 %vm9112_vm8, %v8542_v60 }
 0xf47   :  { %8171 = vmatmul.mubr.msk.f32.vlgmr.msra.gmra.mrb[72].mxu1 %vm1211_vm6, %v5925_v31 }
 0xf48   :  { %8160 = vmatmul.mubr.msk.f32.vlgmr.msra.gmra.mrb[80].mxu0 %vm1211_vm6, %v5852_v41 }
 0xf71   :  { %v3641_v2 = vpop.permute.xlu0 %3640  ;;  %v3633_v52 = vpop.permute.xlu1 %3632 }
 0xf72   :  { %vm3643_vm15 = vcmp.gt.f32.partialorder %v3641_v2, %v9728_v17  ;;  %vm3635_vm2 = vcmp.gt.f32.partialorder %v3633_v52, %v9728_v17 }
 0xf73   :  { %v7018_v39 = vsel %vm3643_vm15, 1.0, %v8716_v5  ;;  %v7017_v55 = vsel %vm3635_vm2, 1.0, %v8716_v5 }
 0xf74   :  { %v3646_v4 = vadd.f32 %v7018_v39, %v7017_v55 }
 0xf76   :  { %v3649_v3 = vpop.permute.xlu1 %3648 }
 0xf77   :  { %vm3651_vm0 = vcmp.gt.f32.partialorder %v3649_v3, %v9728_v17 }
 0xf78   :  { %v7019_v44 = vsel %vm3651_vm0, 1.0, %v8716_v5 }
 0xf79   :  { %v3654_v24 = vadd.f32 %v7019_v44, %v3646_v4 }
 0xf7b   :  { %v3657_v22 = vpop.permute.xlu1 %3656 }
 0xf7c   :  { %vm3659_vm3 = vcmp.gt.f32.partialorder %v3657_v22, %v9728_v17 }
 0xf7d   :  { %v7020_v7 = vsel %vm3659_vm3, 1.0, %v8716_v5 }
 0xf7e   :  { %v3662_v62 = vadd.f32 %v7020_v7, %v3654_v24 }
 0xf80   :  { %vm3663_vm4 = vcmp.lt.f32.partialorder %v3662_v62, 2.0 }
 0xf81   :  { %v3664_v8 = vsel %vm3663_vm4, %v9728_v17, 0.0 }
 0xf82   :  { %v3665_v12 = vsel %vm189_vm7, %v3664_v8, 0.0 }
 0xf83   :  { %3666 = vadd.xlane.f32.xlu1 %v3665_v12 }
 0xfea   :  { %v6083_v9 = vpop.f32.mrb[66].mxu1 }
 0xfeb   :  { %v6010_v10 = vpop.f32.mrb[74].mxu0  ;;  %v8106_v57 = vpop.f32.mrb[67].mxu1 }
 0xfec   :  { %v8095_v13 = vpop.f32.mrb[75].mxu0 }
 0xffa   :  { %v6241_v20 = vpop.f32.mrb[68].mxu1 }
 0xffb   :  { %v6168_v21 = vpop.f32.mrb[76].mxu0  ;;  %v8128_v36 = vpop.f32.mrb[69].mxu1 }
 0xffc   :  { %v8117_v23 = vpop.f32.mrb[77].mxu0 }
0x100a   :  { %v6399_v25 = vpop.f32.mrb[70].mxu1 }
0x100b   :  { %v6326_v58 = vpop.f32.mrb[78].mxu0  ;;  %v8150_v59 = vpop.f32.mrb[71].mxu1 }
0x100c   :  { %v8139_v26 = vpop.f32.mrb[79].mxu0 }
0x1010   :  { %v3667_v5 = vpop.xlane.xlu1 %3666 }
0x1011   :  { %8678 = vrcp.f32 %v3667_v5  ;;  %v7174_v5 = vld [vmem:[%s9936_s2 + $0x68] sm:$0xff] }
0x101a   :  { %v6557_v27 = vpop.f32.mrb[72].mxu1 }
0x101b   :  { %v8679_v29 = vpop.eup %8678  ;;  %v6484_v17 = vpop.f32.mrb[80].mxu0 }
0x101c   :  { %v8172_v32 = vpop.f32.mrb[73].mxu1  ;;  %v8161_v0 = vpop.f32.mrb[81].mxu0  ;;  %v3669_v33 = vmul.f32 %v8679_v29, %v3664_v8  ;;  %v7175_v29 = vld [vmem:[%s9936_s2 + $0x70] sm:$0xff] }
0x101d   :  { %v7177_v0 = vld [vmem:[%s9936_s2 + $0x80] sm:$0xff] }
0x101e   :  { %v6564_v47 = vrot.slane %v3669_v33, %v9046_v61  ;;  %v6571_v35 = vrot.slane %v3669_v33, %v9244_v15  ;;  %v7178_v33 = vld [vmem:[%s9936_s2 + $0x88] sm:$0xff] }
0x1020   :  { %6566 = vbcast.lane.b32.xlu0 %v6564_v47, 256  ;;  %v7179_v47 = vld [vmem:[%s9936_s2 + $0x90] sm:$0xff] }
0x1024   :  { %6573 = vbcast.lane.b32.xlu0 %v6571_v35, 256  ;;  %v8561_v35 = vpack.c.bf16 %v7178_v33, %v7177_v0  ;;  %v6885_v0 = vrot.slane %v9653_v16, %v3456_v51 }
0x1026   :  { %8562 = vmatprep.subr.bf16.mxu1 %v8561_v35 }
0x1027   :  { %8564 = vmatpush3.bf16.msra.mxu1 %v8561_v35  ;;  %v6891_v35 = vrot.slane %v9653_v16, %v3462_v38 }
0x1092   :  { %v6567_v37 = vpop.permute.xlu0 %6566 }
0x1093   :  { %v6578_v45 = vrot.slane %v6567_v37, %v9046_v61  ;;  %v6582_v40 = vrot.slane %v6567_v37, %v9244_v15  ;;  %v6586_v28 = vrot.slane %v6567_v37, %v9248_v18  ;;  %v6590_v30 = vrot.slane %v6567_v37, %v9251_v19  ;;  %v7180_v37 = vld [vmem:[%s9936_s2 + $0x98] sm:$0xff] }
0x1095   :  { %v6607_v31 = vmul.f32 %v6578_v45, %v6010_v10  ;;  %v6608_v41 = vmul.f32 %v6582_v40, %v6168_v21  ;;  %v6609_v1 = vmul.f32 %v6586_v28, %v6326_v58  ;;  %v6610_v50 = vmul.f32 %v6590_v30, %v6484_v17  ;;  %v7176_v17 = vld [vmem:[%s9936_s2 + $0x78] sm:$0xff]  ;;  %v7181_v40 = vld [vmem:[%s9936_s2 + $0xa0] sm:$0xff]  ;;  %v7182_v28 = vld [vmem:[%s9936_s2 + $0xa8] sm:$0xff] }
0x1096   :  { %v6574_v49 = vpop.permute.xlu0 %6573  ;;  %v8557_v32 = vpack.c.bf16 %v7176_v17, %v7175_v29  ;;  %v8565_v45 = vpack.c.bf16 %v7180_v37, %v7179_v47  ;;  %v8569_v30 = vpack.c.bf16 %v7182_v28, %v7181_v40 }
0x1097   :  { %v6594_v46 = vrot.slane %v6574_v49, %v9046_v61  ;;  %v6598_v48 = vrot.slane %v6574_v49, %v9244_v15  ;;  %v6602_v63 = vrot.slane %v6574_v49, %v9248_v18  ;;  %v6606_v54 = vrot.slane %v6574_v49, %v9251_v19 }
0x1098   :  { %v6615_v56 = vsel %vm112_vm1, %v6607_v31, 0.0  ;;  %v6616_v11 = vsel %vm112_vm1, %v6608_v41, 0.0  ;;  %v6618_v52 = vsel %vm112_vm1, %v6609_v1, 0.0  ;;  %v6620_v44 = vsel %vm112_vm1, %v6610_v50, 0.0  ;;  %8566 = vmatprep.subr.bf16.mxu1 %v8565_v45 }
0x1099   :  { %v6611_v14 = vmul.f32 %v6594_v46, %v6083_v9  ;;  %v6612_v43 = vmul.f32 %v6598_v48, %v6241_v20  ;;  %v6613_v60 = vmul.f32 %v6602_v63, %v6399_v25  ;;  %v6617_v2 = vadd.f32 %v6616_v11, %v6615_v56  ;;  %8568 = vmatpush3.bf16.msra.mxu1 %v8565_v45 }
0x109a   :  { %v6614_v39 = vmul.f32 %v6606_v54, %v6557_v27  ;;  %8570 = vmatprep.subr.bf16.mxu1 %v8569_v30  ;;  %v6660_v63 = vrot.slane %v9653_v16, %v9251_v19  ;;  %v6666_v56 = vrot.slane %v9653_v16, %v3237_v34  ;;  %v7183_v19 = vld [vmem:[%s9936_s2 + $0xb0] sm:$0xff]  ;;  %v6685_v34 = vrot.slane %v9653_v16, %v9244_v15 }
0x109b   :  { %v6619_v3 = vadd.f32 %v6618_v52, %v6617_v2  ;;  %v6622_v61 = vsel %vm112_vm1, %v6611_v14, 0.0  ;;  %v6623_v55 = vsel %vm112_vm1, %v6612_v43, 0.0  ;;  %v6625_v24 = vsel %vm112_vm1, %v6613_v60, 0.0 }
0x109c   :  { %v6624_v4 = vadd.f32 %v6623_v55, %v6622_v61  ;;  %v6627_v8 = vsel %vm112_vm1, %v6614_v39, 0.0 }
0x109d   :  { %v6621_v22 = vadd.f32 %v6620_v44, %v6619_v3  ;;  %8572 = vmatpush3.bf16.msra.mxu1 %v8569_v30  ;;  %v7184_v3 = vld [vmem:[%s9936_s2 + $0xb8] sm:$0xff] }
0x109e   :  { %v6626_v7 = vadd.f32 %v6625_v24, %v6624_v4  ;;  %v8573_v39 = vpack.c.bf16 %v7184_v3, %v7183_v19 }
0x109f   :  { %v6629_v62 = vadd.f32 %v6621_v22, %v9362_v42 }
0x10a0   :  { %v6628_v12 = vadd.f32 %v6627_v8, %v6626_v7  ;;  %8574 = vmatprep.subr.bf16.mxu1 %v8573_v39  ;;  %v6772_v7 = vrot.slane %v9653_v16, %v9248_v18 }
0x10a1   :  { %v6631_v9 = vsel %vm112_vm1, %v6629_v62, 0.0  ;;  %8576 = vmatpush3.bf16.msra.mxu1 %v8573_v39 }
0x10a2   :  { %6632 = vadd.xlane.f32.xlu0 %v6631_v9  ;;  %v6630_v10 = vadd.f32 %v6628_v12, %v9372_v53  ;;  %v7173_v53 = vld [vmem:[%s9936_s2 + $0x60] sm:$0xff]  ;;  %s8721_s2 = smov [#allocation2]  }
0x10a3   :  { %v8553_v27 = vpack.c.bf16 %v7174_v5, %v7173_v53  ;;  %s6901_s13 = sshll.u32 %s8721_s2, 4  ;;  %s6902_s13 = int_to_ptr.vmem [resolvable:$true] %s6901_s13 }
0x10a4   :  { %v6634_v57 = vsel %vm112_vm1, %v6630_v10, 0.0  ;;  %s8690_s3 = scalar_lea.vmem %s6902_s13, 256  ;;  %p8695_p1 = scmp.lt.s32.totalorder %s6902_s13, %s6902_s13 }
0x10a5   :  { %6635 = vadd.xlane.f32.xlu1 %v6634_v57  ;;  %8554 = vmatprep.subr.bf16.mxu0 %v8553_v27  ;;  %p8691_p0 = scmp.ne.s32.totalorder %s6902_s13, %s8690_s3  ;;  %p8696_p2 = scmp.lt.s32.totalorder %s8690_s3, %s8690_s3 }
0x10a6   :  { %8556 = vmatpush3.bf16.msra.mxu0 %v8553_v27 }
0x10a7   :  { %8558 = vmatprep.subr.bf16.mxu0 %v8557_v32  ;;  %p8697_p3 = por %p8696_p2, %p8695_p1 }
0x10a9   :  { %p8698_p4 = pnand %p8697_p3, %p8691_p0 }
0x10aa   :  { %8560 = vmatpush3.bf16.msra.mxu0 %v8557_v32 }
0x112f   :  { %v6633_v13 = vpop.xlane.xlu0 %6632 }
0x1130   :  { %v6637_v20 = vmul.f32 0.03125, %v6633_v13 }
0x1132   :  { %v6639_v21 = vsub.f32 %v6629_v62, %v6637_v20  ;;  %v6636_v36 = vpop.xlane.xlu1 %6635 }
0x1133   :  { %v6638_v23 = vmul.f32 0.03125, %v6636_v36 }
0x1134   :  { %v6641_v25 = vmul.f32 %v6639_v21, %v6639_v21 }
0x1135   :  { %v6640_v58 = vsub.f32 %v6630_v10, %v6638_v23 }
0x1136   :  { %v6643_v42 = vsel %vm112_vm1, %v6641_v25, 0.0 }
0x1137   :  { %6644 = vadd.xlane.f32.xlu1 %v6643_v42  ;;  %v6642_v59 = vmul.f32 %v6640_v58, %v6640_v58 }
0x1139   :  { %v6646_v26 = vsel %vm112_vm1, %v6642_v59, 0.0 }
0x113b   :  { %6647 = vadd.xlane.f32.xlu1 %v6646_v26 }
0x11c4   :  { %v6645_v31 = vpop.xlane.xlu1 %6644 }
0x11c5   :  { %v6649_v41 = vmul.f32 0.03125, %v6645_v31 }
0x11c7   :  { %v6651_v1 = vadd.f32 1e-05, %v6649_v41 }
0x11c8   :  { %v6648_v49 = vpop.xlane.xlu1 %6647 }
0x11c9   :  { %8680 = vrsqrt.f32 %v6651_v1  ;;  %v6650_v46 = vmul.f32 0.03125, %v6648_v49 }
0x11cb   :  { %v6652_v48 = vadd.f32 1e-05, %v6650_v46 }
0x11cd   :  { %8682 = vrsqrt.f32 %v6652_v48 }
0x11d3   :  { %v8681_v54 = vpop.eup %8680 }
0x11d4   :  { %v6655_v50 = vmul.f32 %v8681_v54, %v6639_v21 }
0x11d6   :  { %v6661_v11 = vmul.f32 %v6660_v63, %v6655_v50 }
0x11d7   :  { %v8683_v14 = vpop.eup %8682 }
0x11d8   :  { %v6656_v43 = vmul.f32 %v8683_v14, %v6640_v58  ;;  %v6667_v60 = vadd.f32 %v6666_v56, %v6661_v11 }
0x11da   :  { %v6662_v2 = vmul.f32 %v6660_v63, %v6656_v43  ;;  %8181 = vmatprep.mubr.msk.f32.mxu0 %vm112_vm1, %v6667_v60 }
0x11dc   :  { %v6668_v52 = vadd.f32 %v6666_v56, %v6662_v2 }
0x11de   :  { %8182 = vmatmul.mubr.msk.f32.vlgmr.msra.gmra.mrb[82].mxu0 %vm112_vm1, %v6668_v52 }
0x12b1   :  { %v8183_v61 = vpop.f32.mrb[82].mxu0 }
0x12b2   :  { %v6764_v55 = vadd.f32 %v8183_v61, %v6685_v34  ;;  %v6758_v44 = vpop.f32.mrb[83].mxu0 }
0x12b3   :  { %v6759_v4 = vadd.f32 %v6758_v44, %v6685_v34 }
0x12b4   :  { %v6768_v24 = vmax.f32 %v6764_v55, 0.0 }
0x12b5   :  { %v6767_v22 = vmax.f32 %v6759_v4, 0.0 }
0x12b7   :  { %8200 = vmatprep.mubr.msk.f32.mxu1 %vm3344_vm14, %v6767_v22 }
0x12b8   :  { %8201 = vmatmul.mubr.msk.f32.vlgmr.msra.gmra.mrb[74].mxu1 %vm3344_vm14, %v6768_v24 }
0x138b   :  { %v8202_v62 = vpop.f32.mrb[74].mxu1 }
0x138c   :  { %v6845_v8 = vpop.f32.mrb[75].mxu1  ;;  %v6851_v12 = vadd.f32 %v8202_v62, %v6772_v7 }
0x138d   :  { %v6846_v9 = vadd.f32 %v6845_v8, %v6772_v7 }
0x138e   :  { %v6855_v57 = vadd.f32 %v6851_v12, %v6668_v52 }
0x138f   :  { %v6854_v10 = vadd.f32 %v6846_v9, %v6667_v60 }
0x1390   :  { %v6859_v13 = vsel %vm112_vm1, %v6855_v57, 0.0 }
0x1391   :  { %v6856_v15 = vsel %vm112_vm1, %v6854_v10, 0.0 }
0x1392   :  { %6857 = vadd.xlane.f32.xlu1 %v6856_v15 }
0x1396   :  { %6860 = vadd.xlane.f32.xlu1 %v6859_v13 }
0x141f   :  { %v6858_v20 = vpop.xlane.xlu1 %6857 }
0x1420   :  { %v6862_v21 = vmul.f32 0.03125, %v6858_v20 }
0x1422   :  { %v6864_v36 = vsub.f32 %v6854_v10, %v6862_v21 }
0x1423   :  { %v6861_v23 = vpop.xlane.xlu1 %6860 }
0x1424   :  { %v6863_v25 = vmul.f32 0.03125, %v6861_v23  ;;  %v6866_v58 = vmul.f32 %v6864_v36, %v6864_v36 }
0x1426   :  { %v6865_v42 = vsub.f32 %v6855_v57, %v6863_v25  ;;  %v6868_v18 = vsel %vm112_vm1, %v6866_v58, 0.0 }
0x1427   :  { %6869 = vadd.xlane.f32.xlu1 %v6868_v18 }
0x1428   :  { %v6867_v59 = vmul.f32 %v6865_v42, %v6865_v42 }
0x142a   :  { %v6871_v26 = vsel %vm112_vm1, %v6867_v59, 0.0 }
0x142b   :  { %6872 = vadd.xlane.f32.xlu0 %v6871_v26 }
0x14b4   :  { %v6870_v53 = vpop.xlane.xlu1 %6869 }
0x14b5   :  { %v6874_v5 = vmul.f32 0.03125, %v6870_v53 }
0x14b7   :  { %v6876_v27 = vadd.f32 1e-05, %v6874_v5 }
0x14b8   :  { %v6873_v29 = vpop.xlane.xlu0 %6872 }
0x14b9   :  { %8684 = vrsqrt.f32 %v6876_v27  ;;  %v6875_v17 = vmul.f32 0.03125, %v6873_v29 }
0x14bb   :  { %v6877_v32 = vadd.f32 1e-05, %v6875_v17 }
0x14bd   :  { %8686 = vrsqrt.f32 %v6877_v32 }
0x14c3   :  { %v8685_v33 = vpop.eup %8684 }
0x14c4   :  { %v6880_v47 = vmul.f32 %v8685_v33, %v6864_v36 }
0x14c6   :  { %v6886_v37 = vmul.f32 %v6885_v0, %v6880_v47 }
0x14c7   :  { %v8687_v45 = vpop.eup %8686 }
0x14c8   :  { %v6881_v40 = vmul.f32 %v8687_v45, %v6865_v42  ;;  %v6892_v28 = vadd.f32 %v6891_v35, %v6886_v37 }
0x14ca   :  { %v6887_v30 = vmul.f32 %v6885_v0, %v6881_v40  ;;  %6894 = vst.msk [vmem:[#allocation2] sm:$0xff] %vm112_vm1, %v6892_v28 }
0x14cc   :  { %v6893_v31 = vadd.f32 %v6891_v35, %v6887_v30 }
0x14ce   :  { %6895 = vst.msk [vmem:[#allocation2 + $0x8] sm:$0xff] %vm112_vm1, %v6893_v31 }
0x14cf   :  { %8701 = shalt.err (!%p8698_p4)
}
0x14d0   :  { %s8702_s16 = scalar_lea.hbm %s9938_s4, 256 }
0x14d1   :  { %p8703_p5 = scmp.ne.s32.totalorder %s9938_s4, %s8702_s16  ;;  %p8706_p6 = scmp.lt.u32.totalorder %s8702_s16, %s9938_s4 }
0x14d3   :  { %p8708_p7 = pnand %p8706_p6, %p8703_p5 }
0x14d5   :  { %8711 = shalt.err (!%p8708_p7)
}
0x14d6   :  { %s8722_s20 = smov 128   ;;  %s8723_s21 = smov 8  }
0x14d7   :  { %6907 = dma.vmem_to_hbm [thread:$0]  %s6902_s13, 256, %s9938_s4, [#allocation3], %s8722_s20, %s8722_s20, %s8723_s21  }
0x14d8   :  { %8712 = dma.done.wait [#allocation3], 256  }
0x14d9   :  { %8713 = vsyncadd [#allocation3], 4294967040 }
0x14da   :  { %6911 = vsyncpa [#allocation3], 1 }

</bundles_post_ra>
